<compile_context>
chip_gen: v6e
topology: v6e:2x2x1
jax: 0.10.0
libtpu: 0.0.40
codegen_flags: <defaults>
</compile_context>

<pallas_src>
import jax
import jax.numpy as jnp
from jax.experimental import pallas as pl
from jax.experimental.pallas import tpu as pltpu


def _granite_mlp_kernel(x_ref, wg_ref, wu_ref, wd_ref, o_ref, acc_ref):
    """One (token-tile i, intermediate-tile j) grid step.

    x_ref  : (tm, H)  token tile (resident across the I axis)
    wg_ref : (H, ti)  gate-proj column slice of the merged weight
    wu_ref : (H, ti)  up-proj column slice of the merged weight
    wd_ref : (ti, H)  down-proj row slice
    o_ref  : (tm, H)  output tile
    acc_ref: (tm, H)  f32 accumulator scratch (persists across the I axis)
    """
    j = pl.program_id(1)

    @pl.when(j == 0)
    def _():
        acc_ref[...] = jnp.zeros_like(acc_ref)

    x = x_ref[...]
    # gate / up column slices for this I-tile, f32 accumulation on the MXU.
    gate = jnp.dot(x, wg_ref[...], preferred_element_type=jnp.float32)
    up = jnp.dot(x, wu_ref[...], preferred_element_type=jnp.float32)

    # SiluAndMul in f32 (EUP sigmoid + VPU muls hide under the MXU work).
    act = (gate * jax.nn.sigmoid(gate)) * up

    # Partial down-projection for this I-tile, accumulated into the f32 scratch.
    acc_ref[...] += jnp.dot(act.astype(wd_ref.dtype), wd_ref[...],
                            preferred_element_type=jnp.float32)

    @pl.when(j == pl.num_programs(1) - 1)
    def _():
        o_ref[...] = acc_ref[...].astype(o_ref.dtype)


def _largest_tile(total, requested, quantum):
    """Largest multiple of `quantum` that divides `total` and is <= requested."""
    t = max(quantum, (min(requested, total) // quantum) * quantum)
    while total % t != 0:
        t -= quantum
    return t


def _vmem_capacity_bytes():
    """Physical VMEM per TensorCore; conservative fallback if unavailable."""
    try:
        info = pltpu.get_tpu_info()
        cap = getattr(info, "vmem_capacity_bytes", None)
        if cap:
            return int(cap)
    except Exception:
        pass
    return 64 << 20  # v7x per-TensorCore VMEM (most restrictive)


def granite_mlp(x, w_gate_up, w_down, *, tm=None, ti=512):
    """x: [T, H]; w_gate_up: [H, 2*I]; w_down: [I, H] -> [T, H]."""
    T, H = x.shape
    two_I = w_gate_up.shape[1]
    I = two_I // 2
    assert w_gate_up.shape == (H, two_I)
    assert w_down.shape == (I, H)
    assert H % 128 == 0, "hidden size must be a multiple of 128"
    assert I % 128 == 0, "intermediate size must be a multiple of 128"

    vmem_cap = _vmem_capacity_bytes()
    big_vmem = vmem_cap >= (96 << 20)   # v5e/v6e: 128 MiB; v7x: 64 MiB per TC

    # Token tile: multiple of 8 sublanes, scaled toward the roofline crossover
    # (weights are re-streamed once per token tile -> arithmetic intensity ~ tm).
    if tm is None:
        tm = 512 if big_vmem else 256
    tm = max(8, (tm // 8) * 8)

    # Tiny decode batches: pad to one sublane group (8 rows) so the block never
    # exceeds the array; otherwise run on the unpadded activations and let Pallas
    # handle the partial trailing token block.
    x_in, t_rows = x, T
    if T < 8:
        x_in = jnp.pad(x, ((0, 8 - T), (0, 0)))
        t_rows = 8
    tm = min(tm, (t_rows // 8) * 8)
    grid_m = pl.cdiv(t_rows, tm)

    # Intermediate tile: largest 128-multiple divisor of I not exceeding request.
    ti = _largest_tile(I, ti, 128)
    n_i = I // ti

    xbytes = x.dtype.itemsize
    wbytes = w_gate_up.dtype.itemsize

    # Working set: double-buffered tiles + f32 accumulator + the f32 gate/up/act
    # intermediates that Mosaic materializes in VMEM.
    working = (2 * tm * H * xbytes            # x tile (double-buffered)
               + 2 * 2 * H * ti * wbytes      # gate + up weight slices
               + 2 * ti * H * wbytes          # down weight slice
               + 2 * tm * H * xbytes          # output tile
               + tm * H * 4                   # f32 accumulator scratch
               + 3 * tm * ti * 4)             # f32 gate/up/act intermediates
    cap = (100 << 20) if big_vmem else (56 << 20)
    vmem_limit = min(cap, max(32 << 20, int(working * 1.25)))

    cost = pl.CostEstimate(
        flops=6 * T * H * I,                       # gate + up + down matmuls
        transcendentals=T * I,                     # sigmoid
        bytes_accessed=(T * H * xbytes             # x
                        + grid_m * 3 * H * I * wbytes  # weights, re-streamed per tile
                        + T * H * xbytes),         # output
    )

    out = pl.pallas_call(
        _granite_mlp_kernel,
        out_shape=jax.ShapeDtypeStruct((t_rows, H), x.dtype),
        grid_spec=pltpu.PrefetchScalarGridSpec(
            num_scalar_prefetch=0,
            grid=(grid_m, n_i),
            in_specs=[
                pl.BlockSpec((tm, H), lambda i, j: (i, 0)),          # x token tile
                pl.BlockSpec((H, ti), lambda i, j: (0, j)),          # gate cols
                pl.BlockSpec((H, ti), lambda i, j: (0, j + n_i)),    # up cols (offset I)
                pl.BlockSpec((ti, H), lambda i, j: (j, 0)),          # down rows
            ],
            out_specs=pl.BlockSpec((tm, H), lambda i, j: (i, 0)),
            scratch_shapes=[pltpu.VMEM((tm, H), jnp.float32)],
        ),
        compiler_params=pltpu.CompilerParams(
            dimension_semantics=("parallel", "arbitrary"),
            vmem_limit_bytes=vmem_limit,
        ),
        cost_estimate=cost,
    )(x_in, w_gate_up, w_gate_up, w_down)   # merged weight passed twice, never sliced

    return out[:T] if t_rows != T else out


def granite_mlp_ref(x, w_gate_up, w_down):
    """Reference with matching mixed precision (bf16 matmul inputs, f32 accum)."""
    I = w_down.shape[0]
    gu = jnp.dot(x, w_gate_up, preferred_element_type=jnp.float32)
    gate, up = gu[:, :I], gu[:, I:]
    act = (gate * jax.nn.sigmoid(gate)) * up
    out = jnp.dot(act.astype(w_down.dtype), w_down,
                  preferred_element_type=jnp.float32)
    return out.astype(x.dtype)


if __name__ == "__main__":
    # Small shapes consistent with the module; T is deliberately ragged to
    # exercise the partial trailing token block. hidden=256, intermediate=512.
    T, H, I = 130, 256, 512
    dtype = jnp.bfloat16

    key = jax.random.PRNGKey(0)
    kx, kgu, kd = jax.random.split(key, 3)

    x = jax.random.normal(kx, (T, H), dtype=jnp.float32).astype(dtype)
    w_gate_up = (jax.random.normal(kgu, (H, 2 * I), dtype=jnp.float32)
                 * (1.0 / H ** 0.5)).astype(dtype)
    w_down = (jax.random.normal(kd, (I, H), dtype=jnp.float32)
              * (1.0 / I ** 0.5)).astype(dtype)

    ref = granite_mlp_ref(x, w_gate_up, w_down)

    # Explicit small tiles (exercises the I-axis reduction, n_i = 2).
    out = jax.block_until_ready(granite_mlp(x, w_gate_up, w_down, tm=64, ti=256))
    assert out.shape == (T, H)
    assert jnp.allclose(out.astype(jnp.float32), ref.astype(jnp.float32),
                        atol=5e-2, rtol=5e-2), "mismatch vs reference (tm=64)"

    # Auto-tiled path (per-chip tm/ti/vmem selection, partial trailing block).
    out_auto = jax.block_until_ready(granite_mlp(x, w_gate_up, w_down))
    assert out_auto.shape == (T, H)
    assert jnp.allclose(out_auto.astype(jnp.float32), ref.astype(jnp.float32),
                        atol=5e-2, rtol=5e-2), "mismatch vs reference (auto)"

    print("KERNEL_OK")
</pallas_src>

<mosaic_0001>
module attributes {stable_mosaic.version = 11 : i64} {
  func.func @_granite_mlp_kernel(%arg0: i32, %arg1: i32, %arg2: memref<64x256xbf16, #tpu.memory_space<vmem>>, %arg3: memref<256x256xbf16, #tpu.memory_space<vmem>>, %arg4: memref<256x256xbf16, #tpu.memory_space<vmem>>, %arg5: memref<256x256xbf16, #tpu.memory_space<vmem>>, %arg6: memref<64x256xbf16, #tpu.memory_space<vmem>>, %arg7: memref<64x256xf32, #tpu.memory_space<vmem>>) attributes {dimension_semantics = [#tpu.dimension_semantics<parallel>, #tpu.dimension_semantics<arbitrary>], iteration_bounds = array<i64: 3, 2>, scalar_prefetch = 0 : i64, scratch_operands = 1 : i64, tpu.core_type = #tpu.core_type<tc>, window_params = [{transform_indices = @transform_0, window_bounds = array<i64: 64, 256>}, {transform_indices = @transform_1, window_bounds = array<i64: 256, 256>}, {transform_indices = @transform_2, window_bounds = array<i64: 256, 256>}, {transform_indices = @transform_3, window_bounds = array<i64: 256, 256>}, {transform_indices = @transform_4, window_bounds = array<i64: 64, 256>}]} {
    %c0_i32 = arith.constant 0 : i32
    %0 = arith.cmpi eq, %arg1, %c0_i32 : i32
    %1 = arith.extui %0 : i1 to i32
    %c0_i32_0 = arith.constant 0 : i32
    %2 = arith.cmpi ne, %1, %c0_i32_0 : i32
    scf.if %2 {
      %cst_16 = arith.constant 0.000000e+00 : f32
      %24 = vector.broadcast %cst_16 : f32 to vector<64x256xf32>
      %c0_17 = arith.constant 0 : index
      %c0_18 = arith.constant 0 : index
      %25 = vector.load %arg7[%c0_17, %c0_18] : memref<64x256xf32, #tpu.memory_space<vmem>>, vector<64x256xf32>
      tpu.vector_store %arg7[%c0_17, %c0_18], %24 {strides = array<i32>} : memref<64x256xf32, #tpu.memory_space<vmem>>, vector<64x256xf32>,
    } else {
    }
    %c0 = arith.constant 0 : index
    %c0_1 = arith.constant 0 : index
    %3 = vector.load %arg2[%c0, %c0_1] : memref<64x256xbf16, #tpu.memory_space<vmem>>, vector<64x256xbf16>
    %c0_2 = arith.constant 0 : index
    %c0_3 = arith.constant 0 : index
    %4 = vector.load %arg3[%c0_2, %c0_3] : memref<256x256xbf16, #tpu.memory_space<vmem>>, vector<256x256xbf16>
    %cst = arith.constant dense<0.000000e+00> : vector<64x256xf32>
    %5 = tpu.matmul %3, %4, %cst {dimension_numbers = #tpu.dot_dimension_numbers<[1], [0], [0], [1], [0, 0, 1, 1], [], []>} : vector<64x256xbf16>, vector<256x256xbf16>, vector<64x256xf32> -> vector<64x256xf32>
    %c0_4 = arith.constant 0 : index
    %c0_5 = arith.constant 0 : index
    %6 = vector.load %arg4[%c0_4, %c0_5] : memref<256x256xbf16, #tpu.memory_space<vmem>>, vector<256x256xbf16>
    %cst_6 = arith.constant dense<0.000000e+00> : vector<64x256xf32>
    %7 = tpu.matmul %3, %6, %cst_6 {dimension_numbers = #tpu.dot_dimension_numbers<[1], [0], [0], [1], [0, 0, 1, 1], [], []>} : vector<64x256xbf16>, vector<256x256xbf16>, vector<64x256xf32> -> vector<64x256xf32>
    %8 = arith.negf %5 : vector<64x256xf32>
    %9 = math.exp %8 : vector<64x256xf32>
    %cst_7 = arith.constant 1.000000e+00 : f32
    %10 = vector.broadcast %cst_7 : f32 to vector<64x256xf32>
    %11 = arith.addf %10, %9 : vector<64x256xf32>
    %12 = arith.divf %10, %11 : vector<64x256xf32>
    %13 = arith.mulf %5, %12 : vector<64x256xf32>
    %14 = arith.mulf %13, %7 : vector<64x256xf32>
    %c0_8 = arith.constant 0 : index
    %c0_9 = arith.constant 0 : index
    %15 = vector.load %arg7[%c0_8, %c0_9] : memref<64x256xf32, #tpu.memory_space<vmem>>, vector<64x256xf32>
    %16 = arith.truncf %14 : vector<64x256xf32> to vector<64x256xbf16>
    %c0_10 = arith.constant 0 : index
    %c0_11 = arith.constant 0 : index
    %17 = vector.load %arg5[%c0_10, %c0_11] : memref<256x256xbf16, #tpu.memory_space<vmem>>, vector<256x256xbf16>
    %cst_12 = arith.constant dense<0.000000e+00> : vector<64x256xf32>
    %18 = tpu.matmul %16, %17, %cst_12 {dimension_numbers = #tpu.dot_dimension_numbers<[1], [0], [0], [1], [0, 0, 1, 1], [], []>} : vector<64x256xbf16>, vector<256x256xbf16>, vector<64x256xf32> -> vector<64x256xf32>
    %19 = arith.addf %15, %18 : vector<64x256xf32>
    %c0_13 = arith.constant 0 : index
    %c0_14 = arith.constant 0 : index
    %20 = vector.load %arg7[%c0_13, %c0_14] : memref<64x256xf32, #tpu.memory_space<vmem>>, vector<64x256xf32>
    tpu.vector_store %arg7[%c0_13, %c0_14], %19 {strides = array<i32>} : memref<64x256xf32, #tpu.memory_space<vmem>>, vector<64x256xf32>,
    %c1_i32 = arith.constant 1 : i32
    %21 = arith.cmpi eq, %arg1, %c1_i32 : i32
    %22 = arith.extui %21 : i1 to i32
    %c0_i32_15 = arith.constant 0 : i32
    %23 = arith.cmpi ne, %22, %c0_i32_15 : i32
    scf.if %23 {
      %c0_16 = arith.constant 0 : index
      %c0_17 = arith.constant 0 : index
      %24 = vector.load %arg7[%c0_16, %c0_17] : memref<64x256xf32, #tpu.memory_space<vmem>>, vector<64x256xf32>
      %25 = arith.truncf %24 : vector<64x256xf32> to vector<64x256xbf16>
      %c0_18 = arith.constant 0 : index
      %c0_19 = arith.constant 0 : index
      %26 = vector.load %arg6[%c0_18, %c0_19] : memref<64x256xbf16, #tpu.memory_space<vmem>>, vector<64x256xbf16>
      tpu.vector_store %arg6[%c0_18, %c0_19], %25 {strides = array<i32>} : memref<64x256xbf16, #tpu.memory_space<vmem>>, vector<64x256xbf16>,
    } else {
    }
    return
  }
  func.func @transform_0(%arg0: i32, %arg1: i32) -> (i32, i32) {
    %c0_i32 = arith.constant 0 : i32
    %c0_i32_0 = arith.constant 0 : i32
    return %arg0, %c0_i32 : i32, i32
  }
  func.func @transform_1(%arg0: i32, %arg1: i32) -> (i32, i32) {
    %c0_i32 = arith.constant 0 : i32
    %c0_i32_0 = arith.constant 0 : i32
    return %c0_i32, %arg1 : i32, i32
  }
  func.func @transform_2(%arg0: i32, %arg1: i32) -> (i32, i32) {
    %c2_i32 = arith.constant 2 : i32
    %0 = arith.addi %arg1, %c2_i32 : i32
    %c0_i32 = arith.constant 0 : i32
    %c0_i32_0 = arith.constant 0 : i32
    return %c0_i32, %0 : i32, i32
  }
  func.func @transform_3(%arg0: i32, %arg1: i32) -> (i32, i32) {
    %c0_i32 = arith.constant 0 : i32
    %c0_i32_0 = arith.constant 0 : i32
    return %arg1, %c0_i32 : i32, i32
  }
  func.func @transform_4(%arg0: i32, %arg1: i32) -> (i32, i32) {
    %c0_i32 = arith.constant 0 : i32
    %c0_i32_0 = arith.constant 0 : i32
    return %arg0, %c0_i32 : i32, i32
  }
}

</mosaic_0001>

<bundles_post_ra>
// kernel: tpu_custom_call.1
= control target key start
LH: loop header
LB: loop body
LE: loop exit
PB: predicated region body
PF: predicated region fallthrough
CT: control target
= control target key end

     0   :  { %s3131_s0 = inlined_call_operand.hbm [shape: bf16[130,256], index: 0, kind: input, shape index: {}]   ;;  %s3132_s1 = inlined_call_operand.hbm [shape: bf16[256,1024], index: 1, kind: input, shape index: {}]   ;;  %s3133_s2 = inlined_call_operand.hbm [shape: bf16[256,1024], index: 2, kind: input, shape index: {}]   ;;  %s3134_s3 = inlined_call_operand.hbm [shape: bf16[512,256], index: 3, kind: input, shape index: {}]   ;;  %s3135_s4 = inlined_call_operand.hbm [shape: bf16[130,256], index: 4, kind: output, shape index: {}]  }
   0x1   :  { %3155 = sst [smem:[#allocation33_spill]] %s3131_s0 }
   0x2   :  { %3156 = sst [smem:[#allocation34_spill]] %s3132_s1 }
   0x3   :  { %3157 = sst [smem:[#allocation35_spill]] %s3135_s4 }
   0x4   :  { %9 = vsyncpa [#allocation4], 0 }
   0x5   :  { %11 = vsyncpa [#allocation4 + $0x1], 0 }
   0x6   :  { %12 = vsyncpa [#allocation7], 0 }
   0x7   :  { %14 = vsyncpa [#allocation7 + $0x1], 0 }
   0x8   :  { %15 = vsyncpa [#allocation10], 0 }
   0x9   :  { %17 = vsyncpa [#allocation10 + $0x1], 0 }
   0xa   :  { %18 = vsyncpa [#allocation5], 0 }
   0xb   :  { %20 = vsyncpa [#allocation5 + $0x1], 0  ;;  %s2541_s15 = smov 0   ;;  %s2543_s16 = smov 0  }
   0xc   :  { %s2545_s17 = smov 0   ;;  %s2547_s18 = smov 0  }
   0xd   :  { %s2549_s19 = smov 0   ;;  %s2551_s20 = smov 0  }
   0xe   :  { %s2553_s21 = smov 0   ;;  %s2555_s22 = smov 0  }
   0xf   :  { %s2557_s23 = smov 0   ;;  %s2559_s24 = smov 0  }
  0x10   :  { %s2561_s25 = smov 0   ;;  %s2563_s26 = smov 0  }
  0x11   :  { %s2565_s27 = smov 0   ;;  %s2567_s28 = smov 0  }
  0x12 LB: > { %3158 = sst [smem:[#allocation17_spill]] %s2453_s16  ;;  %s2612_s29 = sadd.s32 4294967295, %s2501_s28   ;;  %s2501_s28 = sphi %s2567_s28, %s26_s28   ;;  %s2497_s27 = sphi %s2565_s27, %s3221_s27   ;;  %s2493_s26 = sphi %s2563_s26, %s3220_s26   ;;  %s2489_s25 = sphi %s2561_s25, %s3209_s25   ;;  %s2485_s24 = sphi %s2559_s24, %s3219_s24   ;;  %s2481_s23 = sphi %s2557_s23, %s3208_s23   ;;  %s2477_s22 = sphi %s2555_s22, %s3218_s22   ;;  %s2473_s21 = sphi %s2553_s21, %s3217_s21   ;;  %s2469_s20 = sphi %s2551_s20, %s3216_s20   ;;  %s2465_s19 = sphi %s2549_s19, %s3215_s19   ;;  %s2461_s18 = sphi %s2547_s18, %s3205_s18   ;;  %s2457_s17 = sphi %s2545_s17, %s3214_s17   ;;  %s2453_s16 = sphi %s2543_s16, %s3213_s16   ;;  %s2449_s15 = sphi %s2541_s15, %s3203_s15  }
  0x13   : > { %3159 = sst [smem:[#allocation18_spill]] %s2465_s19  ;;  %s35_s5 = sadd.s32 1, %s2493_s26 }
  0x14   : > { %3160 = sst [smem:[#allocation19_spill]] %s2473_s21  ;;  %s38_s6 = sadd.s32 1, %s2497_s27 }
  0x15   : > { %3161 = sst [smem:[#allocation20_spill]] %s2481_s23  ;;  %p36_p0 = scmp.ge.s32.totalorder %s35_s5, 2 }
  0x16   : > { %3162 = sst [smem:[#allocation21_spill]] %s2485_s24  ;;  %s45_s7 = sadd.s32 1, %s2481_s23 }
  0x17   : > { %3163 = sst [smem:[#allocation22_spill]] %s2489_s25  ;;  %p52_p1 = scmp.ne.s32.totalorder %s2481_s23, %s2477_s22 }
  0x18   : > { %3164 = sst [smem:[#allocation23_spill]] %s2497_s27  ;;  %p53_p2 = scmp.eq.s32.totalorder %s2501_s28, 0 }
  0x19   : > { %s3223_s5 = smov (%p36_p0, %s35_s5), 0  ;;  %s3225_s6 = smov (!%p36_p0, %s38_s6), %s2497_s27 }
  0x1a   : > { %3165 = sst [smem:[#allocation24_spill]] %s3223_s5  ;;  %p2629_p3 = por %p53_p2, %p52_p1 }
  0x1b   : > { %p3137_p4 = scmp.ne.s32.totalorder %s2477_s22, %s2473_s21  ;;  %p40_p5 = scmp.ge.s32.totalorder %s3225_s6, 3 }
  0x1c   : > { %p59_p6 = scmp.eq.s32.totalorder %s2612_s29, 0  ;;  %s68_s9 = ssub.s32 %s2493_s26, %s3223_s5 }
  0x1d   : > { %s71_s10 = sadd.s32 1, %s2469_s20  ;;  %s3227_s6 = smov (%p40_p5, %s3225_s6), 0 }
  0x1e   : > { %3167 = sst [smem:[#allocation25_spill]] %s3227_s6  ;;  %p2646_p7 = por %p59_p6, %p3137_p4 }
  0x1f   : > { %p69_p8 = scmp.eq.s32.totalorder %s68_s9, 0  ;;  %s42_s12 = ssub.s32 %s2497_s27, %s3227_s6 }
  0x20   : > { %s3168_s11 = scalar_select %p2646_p7, 1, 0 }
  0x21   : > { %p78_p9 = scmp.ne.s32.totalorder %s2469_s20, %s2465_s19  ;;  %p43_p10 = scmp.eq.s32.totalorder %s42_s12, 0 }
  0x22   : > { %p84_p11 = scmp.ne.s32.totalorder %s2465_s19, %s2461_s18  ;;  %s94_s18 = sadd.s32 2, %s2493_s26 }
  0x23   : > { %s2657_s13 = scalar_select %p69_p8, %s2469_s20, %s71_s10  }
  0x24   : > { %s2660_s14 = scalar_select %p43_p10, %s2481_s23, %s45_s7  }
  0x25   : > { %3169 = sst [smem:[#allocation26_spill]] %s2657_s13  ;;  %p2664_p12 = por %p78_p9, %p53_p2 }
  0x26   : > { %3170 = sst [smem:[#allocation27_spill]] %s2660_s14  ;;  %p2670_p13 = por %p84_p11, %p59_p6 }
  0x27   : > { %s95_s12 = sadd.s32 2, %s3223_s5  ;;  %s99_s10 = sadd.s32 1, %s2457_s17 }
  0x28   : > { %s3172_s30 = scalar_select %p2670_p13, 1, 0 }
  0x29   : > { %s96_s6 = ssub.s32 %s94_s18, %s95_s12  ;;  %p106_p5 = scmp.ne.s32.totalorder %s2457_s17, %s2453_s16 }
  0x2a   : > { %3173 = sst [smem:[#allocation28_spill]] %s3172_s30  ;;  %p97_p0 = scmp.eq.s32.totalorder %s96_s6, 0 }
  0x2b   : > { %p112_p8 = scmp.ne.s32.totalorder %s2453_s16, %s2449_s15  ;;  %p162_p10 = scmp.eq.s32.totalorder %s2612_s29, 5 }
  0x2c   : > { %s2683_s7 = scalar_select %p97_p0, %s2457_s17, %s99_s10  }
  0x2d   : > { %p2687_p9 = por %p106_p5, %p53_p2  ;;  %p2693_p11 = por %p112_p8, %p59_p6 }
  0x2e   : > { %3174 = sst [smem:[#allocation29_spill]] %s2683_s7  ;;  %p2700_p4 = por %p162_p10, %p52_p1 }
  0x2f   : > { %s3176_s13 = scalar_select %p2693_p11, 1, 0 }
  0x30   : > { %s3178_s18 = scalar_select %p2700_p4, 1, 0 }
  0x31   : > { %3177 = sst [smem:[#allocation30_spill]] %s3176_s13  ;;  %s3180_s6 = sadd.s32 4294967294, %s2501_s28  }
  0x32   : > { %3179 = sst [smem:[#allocation31_spill]] %s3178_s18  ;;  %p168_p13 = scmp.eq.s32.totalorder %s3180_s6, 5 }
  0x33   : > { %p3181_p7 = scmp.ne.s32.totalorder %s2477_s22, %s2473_s21  ;;  %p1672_p2 = scmp.ge.s32.totalorder %s2501_s28, 6 }
  0x35   : > { %p2709_p0 = por %p168_p13, %p3181_p7  ;;  %184 = sbr.rel (%p1672_p2) target bundleno = 142 (0x8e), region = 16 }
  0x37   : > { %s3182_s15 = scalar_select %p2709_p0, 1, 0 }
  0x39   : > { %3183 = sst [smem:[#allocation32_spill]] %s3182_s15 }
  0x3a   : > { %187 = sbr.rel (!%p2629_p3) target bundleno = 96 (0x60), region = 20  ;;  %s188_s12 = sand.u32 (%p2629_p3), 1, %s2481_s23  }
  0x3b   : > { %s1674_s10 = sshll.u32 (%p2629_p3), %s2497_s27, 3  ;;  %s1673_s5 = sshll.u32 (%p2629_p3), %s188_s12, 6 }
  0x3c   : > { %s194_s7 = ssub.s32 (%p2629_p3), 17, %s1674_s10  ;;  %s2721_s4 = scalar_lea.sflag (%p2629_p3), [#allocation4], %s188_s12 }
  0x3d   : > { %p195_p1 = scmp.lt.s32.totalorder (%p2629_p3), %s194_s7, 8  ;;  %s192_s15 = scalar_lea.vmem (%p2629_p3), [#allocation3], %s1673_s5 }
  0x3f   : > { %s3229_s7 = smov (!%p195_p1, %s194_s7), 8 }
  0x40   : > { %s2718_s6 = sshll.u32 %s3229_s7, 7 }
  0x41   : > { %s200_s21 = ssub.s32 1024, %s2718_s6 }
  0x42   : > { %201 = vsyncadd %s2721_s4, %s200_s21  ;;  %p1677_p3 = scmp.ne.s32.totalorder %s2718_s6, 0  ;;  %s1840_s8 = sshll.u32 %s2497_s27, 10 }
  0x43   : > { %s3184_s0 = sld [smem:[#allocation33_spill]]  ;;  %s207_s7 = sshll.u32 %s192_s15, 4  ;;  %s2731_s7 = int_to_ptr.vmem [resolvable:$true] %s207_s7 }
  0x49   : > { %s2729_s10 = scalar_lea.hbm %s3184_s0, %s1840_s8  ;;  %s2244_s18 = scalar_lea.hbm %s3184_s0, 2176 }
  0x4a   : > { %s2240_s12 = scalar_lea.hbm %s2729_s10, %s2718_s6 }
  0x4b   : > { %p2241_p6 = scmp.ne.s32.totalorder %s2729_s10, %s2240_s12  ;;  %p2246_p5 = scmp.lt.s32.totalorder %s2244_s18, %s2240_s12 }
  0x4d   : > { %p2242_p7 = pnand %p2241_p6, %p1677_p3 }
  0x4f   : > { %p2243_p13 = pneg %p2242_p7 }
  0x51   : > { %p2248_p8 = pnand %p2246_p5, %p2243_p13 }
  0x53   : > { %2251 = shalt.err (!%p2248_p8)
}
  0x54   : > { %s2252_s23 = scalar_lea.vmem %s2731_s7, %s2718_s6  ;;  %s2503_s25 = smov [#allocation3]  }
  0x55   : > { %p2253_p10 = scmp.ne.s32.totalorder %s2731_s7, %s2252_s23  ;;  %s2256_s15 = sshll.u32 %s2503_s25, 4  ;;  %s2257_s15 = int_to_ptr.vmem [resolvable:$false] %s2256_s15 }
  0x56   : > { %s2258_s8 = scalar_lea.vmem %s2257_s15, 2048  ;;  %p2259_p6 = scmp.lt.s32.totalorder %s2731_s7, %s2257_s15 }
  0x57   : > { %p2254_p2 = pnand %p2253_p10, %p1677_p3  ;;  %p2260_p7 = scmp.lt.s32.totalorder %s2258_s8, %s2252_s23 }
  0x59   : > { %p2255_p1 = pneg %p2254_p2  ;;  %p2261_p0 = por %p2260_p7, %p2259_p6 }
  0x5b   : > { %p2262_p4 = pnand %p2261_p0, %p2255_p1 }
  0x5d   : > { %2265 = shalt.err (!%p2262_p4)
}
  0x5e   : > { %s2504_s18 = smov 128   ;;  %s2505_s12 = smov 8  }
  0x5f   : > { %213 = dma.hbm_to_vmem [thread:$0]  (%p1677_p3), %s2729_s10, %s2718_s6, %s2731_s7, %s2721_s4, %s2504_s18, %s2504_s18, %s2505_s12  }
  0x60 PF: > { %s217_s21 = sand.u32 1, %s2501_s28   ;;  %s3148_s5 = sand.u32 1, %s2469_s20  }
  0x61   : > { %s2757_s23 = sshll.u32 %s3148_s5, 8  ;;  %s1841_s25 = sshll.u32 %s2493_s26, 7 }
  0x62   : > { %s3185_s1 = sld [smem:[#allocation34_spill]]  ;;  %s221_s27 = scalar_lea.vmem [#allocation6], %s2757_s23 }
  0x63   : > { %s228_s24 = sshll.u32 %s221_s27, 4  ;;  %s2764_s4 = scalar_lea.sflag [#allocation7], %s217_s21  ;;  %s229_s24 = int_to_ptr.vmem [resolvable:$true] %s228_s24 }
  0x64   : > { %s2278_s6 = scalar_lea.vmem %s229_s24, 4096  ;;  %s2506_s10 = smov [#allocation6]  }
  0x65   : > { %p2279_p4 = scmp.ne.s32.totalorder %s229_s24, %s2278_s6  ;;  %s2282_s7 = sshll.u32 %s2506_s10, 4  ;;  %s2283_s7 = int_to_ptr.vmem [resolvable:$false] %s2282_s7 }
  0x66   : > { %s2284_s18 = scalar_lea.vmem %s2283_s7, 8192  ;;  %p2285_p13 = scmp.lt.s32.totalorder %s229_s24, %s2283_s7 }
  0x67   : > { %p2280_p0 = pnand %p2279_p4, %p2664_p12  ;;  %p2286_p5 = scmp.lt.s32.totalorder %s2284_s18, %s2278_s6 }
  0x68   : > { %s227_s0 = scalar_lea.hbm %s3185_s1, %s1841_s25 }
  0x69   : > { %p2281_p3 = pneg %p2280_p0  ;;  %p2287_p8 = por %p2286_p5, %p2285_p13 }
  0x6b   : > { %p2288_p10 = pnand %p2287_p8, %p2281_p3 }
  0x6d   : > { %2291 = shalt.err (!%p2288_p10)
}
  0x6e   : > { %s2507_s12 = smov 512   ;;  %s2508_s27 = smov 128  }
  0x6f   : > { %s2509_s21 = smov 8   ;;  %s1565_s6 = scalar_lea.hbm %s3133_s2, %s1841_s25 }
  0x70   : > { %1887 = dma.hbm_to_vmem [thread:$0]  (%p2664_p12), %s227_s0, 4096, %s229_s24, %s2764_s4, %s2507_s12, %s2508_s27, %s2509_s21  }
  0x71   : > { %s240_s10 = sand.u32 1, %s2457_s17   ;;  %s1566_s7 = scalar_lea.hbm %s1565_s6, 256 }
  0x72   : > { %s1685_s18 = sshll.u32 %s240_s10, 8  ;;  %s1843_s13 = sshll.u32 %s2493_s26, 12 }
  0x73   : > { %s242_s5 = scalar_lea.vmem [#allocation8], %s1685_s18  ;;  %s2510_s30 = smov [#allocation8]  }
  0x74   : > { %s250_s1 = sshll.u32 %s242_s5, 4  ;;  %s2308_s19 = sshll.u32 %s2510_s30, 4  ;;  %s251_s1 = int_to_ptr.vmem [resolvable:$true] %s250_s1  ;;  %s2309_s19 = int_to_ptr.vmem [resolvable:$false] %s2308_s19 }
  0x75   : > { %s2304_s16 = scalar_lea.vmem %s251_s1, 4096  ;;  %s2310_s0 = scalar_lea.vmem %s2309_s19, 8192 }
  0x76   : > { %p2305_p2 = scmp.ne.s32.totalorder %s251_s1, %s2304_s16  ;;  %p2311_p7 = scmp.lt.s32.totalorder %s251_s1, %s2309_s19 }
  0x77   : > { %p2312_p4 = scmp.lt.s32.totalorder %s2310_s0, %s2304_s16 }
  0x78   : > { %p2306_p1 = pnand %p2305_p2, %p2687_p9 }
  0x79   : > { %p2313_p0 = por %p2312_p4, %p2311_p7 }
  0x7a   : > { %p2307_p6 = pneg %p2306_p1 }
  0x7c   : > { %p2314_p3 = pnand %p2313_p0, %p2307_p6 }
  0x7e   : > { %2317 = shalt.err (!%p2314_p3)
}
  0x7f   : > { %1888 = dma.hbm_to_vmem [thread:$0]  (%p2687_p9), %s1566_s7, 4096, %s251_s1, %s2764_s4, %s2507_s12, %s2508_s27, %s2509_s21  }
  0x80   : > { %s271_s30 = scalar_lea.hbm %s3134_s3, %s1843_s13  ;;  %s264_s25 = scalar_lea.vmem [#allocation9], %s2757_s23 }
  0x81   : > { %s272_s19 = sshll.u32 %s264_s25, 4  ;;  %s3186_s16 = sand.u32 1, %s2469_s20   ;;  %s273_s19 = int_to_ptr.vmem [resolvable:$true] %s272_s19 }
  0x82   : > { %s261_s15 = scalar_lea.sflag [#allocation10], %s3186_s16  ;;  %s2331_s8 = scalar_lea.vmem %s273_s19, 4096 }
  0x83   : > { %p2332_p13 = scmp.ne.s32.totalorder %s273_s19, %s2331_s8  ;;  %s2511_s14 = smov [#allocation9]  }
  0x84   : > { %s2335_s6 = sshll.u32 %s2511_s14, 4  ;;  %s2336_s6 = int_to_ptr.vmem [resolvable:$false] %s2335_s6 }
  0x85   : > { %p2333_p5 = pnand %p2332_p13, %p2664_p12  ;;  %s2337_s10 = scalar_lea.vmem %s2336_s6, 8192 }
  0x86   : > { %p2338_p10 = scmp.lt.s32.totalorder %s273_s19, %s2336_s6  ;;  %p2339_p9 = scmp.lt.s32.totalorder %s2337_s10, %s2331_s8 }
  0x87   : > { %p2334_p8 = pneg %p2333_p5 }
  0x88   : > { %p2340_p2 = por %p2339_p9, %p2338_p10 }
  0x8a   : > { %p2341_p1 = pnand %p2340_p2, %p2334_p8 }
  0x8c   : > { %2344 = shalt.err (!%p2341_p1)
}
  0x8d   : > { %1889 = dma.hbm_to_vmem [thread:$0]  (%p2664_p12), %s271_s30, 4096, %s273_s19, %s261_s15, %s2508_s27, %s2508_s27, %s2509_s21  }
  0x8e PF: > { %p1691_p6 = scmp.ge.s32.totalorder %s2501_s28, 1  ;;  %p280_p7 = scmp.lt.s32.totalorder %s2501_s28, 7 }
  0x90   : > { %p281_p4 = pnand %p1691_p6, %p280_p7 }
  0x91   : > { %s2803_s1 = sand.u32 (!%p281_p4), 1, %s2477_s22   ;;  %p3187_p0 = scmp.ne.s32.totalorder (!%p281_p4), %s3168_s11, 0 }
  0x92   : > { %284 = sbr.rel (%p281_p4) target bundleno = 781 (0x30d), region = 36  ;;  %s1692_s13 = sshll.u32 (!%p281_p4), %s2803_s1, 6 }
  0x93   : > { %s287_s23 = scalar_lea.sflag (!%p281_p4), [#allocation4], %s2803_s1  ;;  %s2807_s9 = scalar_lea.vmem (!%p281_p4), [#allocation3], %s1692_s13 }
  0x97   : > { %2428 = dma.done.wait (%p3187_p0), %s287_s23, 1024  }
  0x98   : > { %2430 = vsyncadd (%p3187_p0), %s287_s23, 4294966272  ;;  %s3188_s4 = sld [smem:[#allocation18_spill]]  ;;  %s295_s27 = sand.u32 1, %s2612_s29  }
  0x99   : > { %s3189_s12 = sld [smem:[#allocation28_spill]]  ;;  %s296_s18 = scalar_lea.sflag [#allocation7], %s295_s27 }
  0x9e   : > { %s297_s21 = sand.u32 1, %s3188_s4  }
  0x9f   : > { %s1693_s7 = sshll.u32 %s297_s21, 8  ;;  %p3190_p12 = scmp.ne.s32.totalorder %s3189_s12, 0 }
  0xa0   : > { %s2815_s0 = scalar_lea.vmem [#allocation6], %s1693_s7 }
  0xa1   : > { %2432 = dma.done.wait (%p3190_p12), %s296_s18, 4096  }
  0xa2   : > { %2434 = vsyncadd (%p3190_p12), %s296_s18, 4294963200  ;;  %s3191_s24 = sld [smem:[#allocation17_spill]] }
  0xa8   : > { %s306_s30 = sand.u32 1, %s3191_s24  }
  0xa9   : > { %s1694_s25 = sshll.u32 %s306_s30, 8 }
  0xaa   : > { %s2822_s11 = scalar_lea.vmem [#allocation8], %s1694_s25 }
  0xab   : > { %2436 = dma.done.wait (%p2693_p11), %s296_s18, 4096  }
  0xac   : > { %2438 = vsyncadd (%p2693_p11), %s296_s18, 4294963200  ;;  %s314_s29 = scalar_lea.sflag [#allocation10], %s297_s21  ;;  %s2828_s19 = scalar_lea.vmem [#allocation9], %s1693_s7 }
  0xad   : > { %2440 = dma.done.wait (%p3190_p12), %s314_s29, 4096  }
  0xae   : > { %2442 = vsyncadd (%p3190_p12), %s314_s29, 4294963200  ;;  %s2834_s16 = scalar_lea.vmem [#allocation11], %s1692_s13  ;;  %s3193_s15 = sld [smem:[#allocation21_spill]] }
  0xb4   : > { %p1697_p3 = scmp.ne.s32.totalorder %s3193_s15, 0 }
  0xb6   : > { %376 = sbr.rel (%p1697_p3) target bundleno = 196 (0xc4), region = 56 }
  0xbb   : > { %v2512_v0 = vmov 0.0  }
  0xbc   : > { %377 = vst [vmem:[#allocation2 + $0x30] sm:$0xff] %v2512_v0  ;;  %378 = vst [vmem:[#allocation2] sm:$0xff] %v2512_v0 }
  0xbd   : > { %379 = vst [vmem:[#allocation2 + $0x58] sm:$0xff] %v2512_v0  ;;  %380 = vst [vmem:[#allocation2 + $0x18] sm:$0xff] %v2512_v0 }
  0xbe   : > { %381 = vst [vmem:[#allocation2 + $0x50] sm:$0xff] %v2512_v0  ;;  %382 = vst [vmem:[#allocation2 + $0x68] sm:$0xff] %v2512_v0 }
  0xbf   : > { %383 = vst [vmem:[#allocation2 + $0x8] sm:$0xff] %v2512_v0  ;;  %384 = vst [vmem:[#allocation2 + $0x48] sm:$0xff] %v2512_v0 }
  0xc0   : > { %385 = vst [vmem:[#allocation2 + $0x40] sm:$0xff] %v2512_v0  ;;  %386 = vst [vmem:[#allocation2 + $0x20] sm:$0xff] %v2512_v0 }
  0xc1   : > { %387 = vst [vmem:[#allocation2 + $0x10] sm:$0xff] %v2512_v0  ;;  %388 = vst [vmem:[#allocation2 + $0x38] sm:$0xff] %v2512_v0 }
  0xc2   : > { %389 = vst [vmem:[#allocation2 + $0x60] sm:$0xff] %v2512_v0  ;;  %390 = vst [vmem:[#allocation2 + $0x70] sm:$0xff] %v2512_v0 }
  0xc3   : > { %391 = vst [vmem:[#allocation2 + $0x78] sm:$0xff] %v2512_v0  ;;  %392 = vst [vmem:[#allocation2 + $0x28] sm:$0xff] %v2512_v0 }
  0xc4 PF: > { %v2020_v1 = vld [vmem:[%s2815_s0 + $0x74] ss:$8 sps:$4 sm:$0xff]   ;;  %v2022_v2 = vld [vmem:[%s2815_s0 + $0x70] ss:$8 sps:$4 sm:$0xff]   ;;  %v2023_v3 = vld [vmem:[%s2815_s0 + $0x64] ss:$8 sps:$4 sm:$0xff]  }
  0xc5   : > { %633 = vmatprep.subr.bf16.mxu0 %v2020_v1  ;;  %v2025_v4 = vld [vmem:[%s2815_s0 + $0x60] ss:$8 sps:$4 sm:$0xff]   ;;  %v2026_v5 = vld [vmem:[%s2815_s0 + $0x54] ss:$8 sps:$4 sm:$0xff]   ;;  %v2028_v6 = vld [vmem:[%s2815_s0 + $0x50] ss:$8 sps:$4 sm:$0xff]  }
  0xc6   : > { %634 = vmatpush1.bf16.msra.mxu0 %v2022_v2  ;;  %v2029_v7 = vld [vmem:[%s2815_s0 + $0x44] ss:$8 sps:$4 sm:$0xff]   ;;  %v2031_v8 = vld [vmem:[%s2815_s0 + $0x40] ss:$8 sps:$4 sm:$0xff]   ;;  %v2043_v9 = vld [vmem:[%s2822_s11 + $0x74] ss:$8 sps:$4 sm:$0xff]  }
  0xc7   : > { %635 = vmatprep.subr.bf16.mxu0 %v2023_v3  ;;  %v2046_v10 = vld [vmem:[%s2822_s11 + $0x70] ss:$8 sps:$4 sm:$0xff]   ;;  %v2032_v11 = vld [vmem:[%s2815_s0 + $0x34] ss:$8 sps:$4 sm:$0xff]   ;;  %898 = vmatprep.subr.bf16.mxu1 %v2043_v9  ;;  %v2049_v12 = vld [vmem:[%s2822_s11 + $0x64] ss:$8 sps:$4 sm:$0xff]  }
  0xc8   : > { %899 = vmatpush1.bf16.msra.mxu1 %v2046_v10  ;;  %v2052_v13 = vld [vmem:[%s2822_s11 + $0x60] ss:$8 sps:$4 sm:$0xff]   ;;  %v2034_v14 = vld [vmem:[%s2815_s0 + $0x30] ss:$8 sps:$4 sm:$0xff]   ;;  %v2035_v15 = vld [vmem:[%s2815_s0 + $0x24] ss:$8 sps:$4 sm:$0xff]  }
  0xc9   : > { %900 = vmatprep.subr.bf16.mxu1 %v2049_v12  ;;  %v2055_v16 = vld [vmem:[%s2822_s11 + $0x54] ss:$8 sps:$4 sm:$0xff]   ;;  %v2058_v17 = vld [vmem:[%s2822_s11 + $0x50] ss:$8 sps:$4 sm:$0xff]   ;;  %v2037_v18 = vld [vmem:[%s2815_s0 + $0x20] ss:$8 sps:$4 sm:$0xff]  }
  0xca   : > { %636 = vmatpush1.bf16.msra.mxu0 %v2025_v4  ;;  %v2061_v19 = vld [vmem:[%s2822_s11 + $0x44] ss:$8 sps:$4 sm:$0xff]   ;;  %v2038_v20 = vld [vmem:[%s2815_s0 + $0x14] ss:$8 sps:$4 sm:$0xff]   ;;  %v2040_v21 = vld [vmem:[%s2815_s0 + $0x10] ss:$8 sps:$4 sm:$0xff]  }
  0xcb   : > { %637 = vmatprep.subr.bf16.mxu0 %v2026_v5  ;;  %v2064_v22 = vld [vmem:[%s2822_s11 + $0x40] ss:$8 sps:$4 sm:$0xff]   ;;  %v2067_v23 = vld [vmem:[%s2822_s11 + $0x34] ss:$8 sps:$4 sm:$0xff]   ;;  %v2041_v24 = vld [vmem:[%s2815_s0 + $0x4] ss:$8 sps:$4 sm:$0xff]  }
  0xcc   : > { %901 = vmatpush1.bf16.msra.mxu1 %v2052_v13  ;;  %v2070_v25 = vld [vmem:[%s2822_s11 + $0x30] ss:$8 sps:$4 sm:$0xff]   ;;  %v2045_v26 = vld [vmem:[%s2815_s0] ss:$8 sps:$4 sm:$0xff]   ;;  %v2073_v27 = vld [vmem:[%s2822_s11 + $0x24] ss:$8 sps:$4 sm:$0xff]  }
  0xcd   : > { %902 = vmatprep.subr.bf16.mxu1 %v2055_v16  ;;  %v2047_v28 = vld [vmem:[%s2815_s0 + $0xf4] ss:$8 sps:$4 sm:$0xff]   ;;  %v2051_v29 = vld [vmem:[%s2815_s0 + $0xf0] ss:$8 sps:$4 sm:$0xff]   ;;  %v2076_v30 = vld [vmem:[%s2822_s11 + $0x20] ss:$8 sps:$4 sm:$0xff]  }
  0xce   : > { %638 = vmatpush1.bf16.msra.mxu0 %v2028_v6  ;;  %v2079_v31 = vld [vmem:[%s2822_s11 + $0x14] ss:$8 sps:$4 sm:$0xff]   ;;  %v2053_v32 = vld [vmem:[%s2815_s0 + $0xe4] ss:$8 sps:$4 sm:$0xff]   ;;  %v2082_v33 = vld [vmem:[%s2822_s11 + $0x10] ss:$8 sps:$4 sm:$0xff]  }
  0xcf   : > { %639 = vmatprep.subr.bf16.mxu0 %v2029_v7  ;;  %v2097_v34 = vld [vmem:[%s2807_s9 + $0x4] ss:$8 sps:$4 sm:$0xff]   ;;  %v2057_v35 = vld [vmem:[%s2815_s0 + $0xe0] ss:$8 sps:$4 sm:$0xff]   ;;  %v2059_v37 = vld [vmem:[%s2815_s0 + $0xd4] ss:$8 sps:$4 sm:$0xff]  }
  0xd0   : > { %903 = vmatpush1.bf16.msra.mxu1 %v2058_v17  ;;  %v2085_v36 = vld [vmem:[%s2822_s11 + $0x4] ss:$8 sps:$4 sm:$0xff]   ;;  %665 = vmatprep.mubr.bf16.mxu0 %v2097_v34  ;;  %v2088_v38 = vld [vmem:[%s2822_s11] ss:$8 sps:$4 sm:$0xff]   ;;  %v2063_v39 = vld [vmem:[%s2815_s0 + $0xd0] ss:$8 sps:$4 sm:$0xff]  }
  0xd1   : > { %904 = vmatprep.subr.bf16.mxu1 %v2061_v19  ;;  %930 = vmatprep.mubr.bf16.mxu1 %v2097_v34  ;;  %v2091_v40 = vld [vmem:[%s2822_s11 + $0xf4] ss:$8 sps:$4 sm:$0xff]   ;;  %v2065_v41 = vld [vmem:[%s2815_s0 + $0xc4] ss:$8 sps:$4 sm:$0xff]   ;;  %v2094_v42 = vld [vmem:[%s2822_s11 + $0xf0] ss:$8 sps:$4 sm:$0xff]  }
  0xd2   : > { %640 = vmatpush1.bf16.msra.mxu0 %v2031_v8  ;;  %v2069_v43 = vld [vmem:[%s2815_s0 + $0xc0] ss:$8 sps:$4 sm:$0xff]   ;;  %v2098_v44 = vld [vmem:[%s2822_s11 + $0xe4] ss:$8 sps:$4 sm:$0xff]   ;;  %v2071_v45 = vld [vmem:[%s2815_s0 + $0xb4] ss:$8 sps:$4 sm:$0xff]  }
  0xd3   : > { %641 = vmatprep.subr.bf16.mxu0 %v2032_v11  ;;  %v2100_v46 = vld [vmem:[%s2822_s11 + $0xe0] ss:$8 sps:$4 sm:$0xff]   ;;  %v2075_v47 = vld [vmem:[%s2815_s0 + $0xb0] ss:$8 sps:$4 sm:$0xff]   ;;  %v2101_v48 = vld [vmem:[%s2822_s11 + $0xd4] ss:$8 sps:$4 sm:$0xff]  }
  0xd4   : > { %905 = vmatpush1.bf16.msra.mxu1 %v2064_v22  ;;  %v2077_v49 = vld [vmem:[%s2815_s0 + $0xa4] ss:$8 sps:$4 sm:$0xff]   ;;  %v2103_v50 = vld [vmem:[%s2822_s11 + $0xd0] ss:$8 sps:$4 sm:$0xff]   ;;  %v2081_v51 = vld [vmem:[%s2815_s0 + $0xa0] ss:$8 sps:$4 sm:$0xff]  }
  0xd5   : > { %906 = vmatprep.subr.bf16.mxu1 %v2067_v23  ;;  %v2107_v52 = vld [vmem:[%s2822_s11 + $0xc4] ss:$8 sps:$4 sm:$0xff]   ;;  %v2083_v53 = vld [vmem:[%s2815_s0 + $0x94] ss:$8 sps:$4 sm:$0xff]   ;;  %v2087_v54 = vld [vmem:[%s2815_s0 + $0x90] ss:$8 sps:$4 sm:$0xff]  }
  0xd6   : > { %642 = vmatpush1.bf16.msra.mxu0 %v2034_v14  ;;  %v2089_v55 = vld [vmem:[%s2815_s0 + $0x84] ss:$8 sps:$4 sm:$0xff]   ;;  %v2109_v56 = vld [vmem:[%s2822_s11 + $0xc0] ss:$8 sps:$4 sm:$0xff]   ;;  %v2110_v57 = vld [vmem:[%s2822_s11 + $0xb4] ss:$8 sps:$4 sm:$0xff]  }
  0xd7   : > { %643 = vmatprep.subr.bf16.mxu0 %v2035_v15  ;;  %v2112_v58 = vld [vmem:[%s2822_s11 + $0xb0] ss:$8 sps:$4 sm:$0xff]   ;;  %v2093_v59 = vld [vmem:[%s2815_s0 + $0x80] ss:$8 sps:$4 sm:$0xff]   ;;  %v2116_v60 = vld [vmem:[%s2822_s11 + $0xa4] ss:$8 sps:$4 sm:$0xff]  }
  0xd8   : > { %907 = vmatpush1.bf16.msra.mxu1 %v2070_v25  ;;  %v2130_v61 = vld [vmem:[%s2828_s19 + $0x74] ss:$8 sps:$4 sm:$0xff]   ;;  %v2095_v62 = vld [vmem:[%s2807_s9] ss:$8 sps:$4 sm:$0xff]   ;;  %v2128_v2 = vld [vmem:[%s2828_s19 + $0x70] ss:$8 sps:$4 sm:$0xff]  }
  0xd9   : > { %908 = vmatprep.subr.bf16.mxu1 %v2073_v27  ;;  %v2118_v63 = vld [vmem:[%s2822_s11 + $0xa0] ss:$8 sps:$4 sm:$0xff]   ;;  %v2104_v0 = vld [vmem:[%s2807_s9 + $0x14] ss:$8 sps:$4 sm:$0xff]   ;;  %v2133_v3 = vld [vmem:[%s2828_s19 + $0x64] ss:$8 sps:$4 sm:$0xff]  }
  0xda   : > { %644 = vmatpush1.bf16.msra.mxu0 %v2037_v18  ;;  %v2119_v1 = vld [vmem:[%s2822_s11 + $0x94] ss:$8 sps:$4 sm:$0xff]   ;;  %v2121_v4 = vld [vmem:[%s2822_s11 + $0x90] ss:$8 sps:$4 sm:$0xff]   ;;  %v2125_v5 = vld [vmem:[%s2822_s11 + $0x84] ss:$8 sps:$4 sm:$0xff]  }
  0xdb   : > { %645 = vmatprep.subr.bf16.mxu0 %v2038_v20  ;;  %v2131_v6 = vld [vmem:[%s2828_s19 + $0x60] ss:$8 sps:$4 sm:$0xff]   ;;  %v2136_v7 = vld [vmem:[%s2828_s19 + $0x54] ss:$8 sps:$4 sm:$0xff]   ;;  %v2106_v8 = vld [vmem:[%s2807_s9 + $0x10] ss:$8 sps:$4 sm:$0xff]  }
  0xdc   : > { %909 = vmatpush1.bf16.msra.mxu1 %v2076_v30  ;;  %v2127_v9 = vld [vmem:[%s2822_s11 + $0x80] ss:$8 sps:$4 sm:$0xff]   ;;  %v2113_v10 = vld [vmem:[%s2807_s9 + $0x24] ss:$8 sps:$4 sm:$0xff]   ;;  %v2134_v11 = vld [vmem:[%s2828_s19 + $0x50] ss:$8 sps:$4 sm:$0xff]  }
  0xdd   : > { %910 = vmatprep.subr.bf16.mxu1 %v2079_v31  ;;  %v2139_v12 = vld [vmem:[%s2828_s19 + $0x44] ss:$8 sps:$4 sm:$0xff]   ;;  %v2137_v13 = vld [vmem:[%s2828_s19 + $0x40] ss:$8 sps:$4 sm:$0xff]   ;;  %v2142_v14 = vld [vmem:[%s2828_s19 + $0x34] ss:$8 sps:$4 sm:$0xff]  }
  0xde   : > { %646 = vmatpush1.bf16.msra.mxu0 %v2040_v21  ;;  %v2115_v15 = vld [vmem:[%s2807_s9 + $0x20] ss:$8 sps:$4 sm:$0xff]   ;;  %v2122_v16 = vld [vmem:[%s2807_s9 + $0x34] ss:$8 sps:$4 sm:$0xff]   ;;  %v2140_v17 = vld [vmem:[%s2828_s19 + $0x30] ss:$8 sps:$4 sm:$0xff]  }
  0xdf   : > { %647 = vmatprep.subr.bf16.mxu0 %v2041_v24  ;;  %v2124_v18 = vld [vmem:[%s2807_s9 + $0x30] ss:$8 sps:$4 sm:$0xff]   ;;  %v2145_v19 = vld [vmem:[%s2828_s19 + $0x24] ss:$8 sps:$4 sm:$0xff]   ;;  %v2143_v20 = vld [vmem:[%s2828_s19 + $0x20] ss:$8 sps:$4 sm:$0xff]  }
  0xe0   : > { %911 = vmatpush1.bf16.msra.mxu1 %v2082_v33  ;;  %v2148_v21 = vld [vmem:[%s2828_s19 + $0x14] ss:$8 sps:$4 sm:$0xff]   ;;  %v2146_v22 = vld [vmem:[%s2828_s19 + $0x10] ss:$8 sps:$4 sm:$0xff]   ;;  %v2151_v23 = vld [vmem:[%s2828_s19 + $0x4] ss:$8 sps:$4 sm:$0xff]  }
  0xe1   : > { %912 = vmatprep.subr.bf16.mxu1 %v2085_v36  ;;  %v2149_v24 = vld [vmem:[%s2828_s19] ss:$8 sps:$4 sm:$0xff]   ;;  %v2154_v25 = vld [vmem:[%s2828_s19 + $0xf4] ss:$8 sps:$4 sm:$0xff]   ;;  %v2157_v27 = vld [vmem:[%s2828_s19 + $0xe4] ss:$8 sps:$4 sm:$0xff]  }
  0xe2   : > { %648 = vmatpush1.bf16.msra.mxu0 %v2045_v26  ;;  %v2152_v26 = vld [vmem:[%s2828_s19 + $0xf0] ss:$8 sps:$4 sm:$0xff]   ;;  %v2163_v31 = vld [vmem:[%s2828_s19 + $0xc4] ss:$8 sps:$4 sm:$0xff]   ;;  %v2166_v33 = vld [vmem:[%s2828_s19 + $0xb4] ss:$8 sps:$4 sm:$0xff]  }
  0xe3   : > { %649 = vmatprep.subr.bf16.mxu0 %v2047_v28  ;;  %v2155_v28 = vld [vmem:[%s2828_s19 + $0xe0] ss:$8 sps:$4 sm:$0xff]   ;;  %v2158_v30 = vld [vmem:[%s2828_s19 + $0xd0] ss:$8 sps:$4 sm:$0xff]   ;;  %s3194_s8 = sld [smem:[#allocation21_spill]] }
  0xe4   : > { %913 = vmatpush1.bf16.msra.mxu1 %v2088_v38  ;;  %v2164_v34 = vld [vmem:[%s2828_s19 + $0xb0] ss:$8 sps:$4 sm:$0xff]   ;;  %v2167_v36 = vld [vmem:[%s2828_s19 + $0xa0] ss:$8 sps:$4 sm:$0xff]  }
  0xe5   : > { %914 = vmatprep.subr.bf16.mxu1 %v2091_v40  ;;  %v2170_v38 = vld [vmem:[%s2828_s19 + $0x90] ss:$8 sps:$4 sm:$0xff]   ;;  %v2173_v40 = vld [vmem:[%s2828_s19 + $0x80] ss:$8 sps:$4 sm:$0xff]  }
  0xe6   : > { %650 = vmatpush2.bf16.msra.mxu0 %v2051_v29  ;;  %v2160_v29 = vld [vmem:[%s2828_s19 + $0xd4] ss:$8 sps:$4 sm:$0xff]  }
  0xe7   : > { %651 = vmatprep.subr.bf16.mxu0 %v2053_v32  ;;  %v2161_v32 = vld [vmem:[%s2828_s19 + $0xc0] ss:$8 sps:$4 sm:$0xff]  }
  0xe8   : > { %915 = vmatpush2.bf16.msra.mxu1 %v2094_v42 }
  0xe9   : > { %916 = vmatprep.subr.bf16.mxu1 %v2098_v44  ;;  %p1818_p11 = scmp.ne.s32.totalorder %s3194_s8, 1 }
  0xea   : > { %652 = vmatpush2.bf16.msra.mxu0 %v2057_v35  ;;  %v2169_v35 = vld [vmem:[%s2828_s19 + $0xa4] ss:$8 sps:$4 sm:$0xff]  }
  0xeb   : > { %653 = vmatprep.subr.bf16.mxu0 %v2059_v37  ;;  %v2172_v37 = vld [vmem:[%s2828_s19 + $0x94] ss:$8 sps:$4 sm:$0xff]  }
  0xec   : > { %917 = vmatpush2.bf16.msra.mxu1 %v2100_v46 }
  0xed   : > { %918 = vmatprep.subr.bf16.mxu1 %v2101_v48 }
  0xee   : > { %654 = vmatpush2.bf16.msra.mxu0 %v2063_v39  ;;  %v2175_v39 = vld [vmem:[%s2828_s19 + $0x84] ss:$8 sps:$4 sm:$0xff]  }
  0xef   : > { %655 = vmatprep.subr.bf16.mxu0 %v2065_v41 }
  0xf0   : > { %919 = vmatpush2.bf16.msra.mxu1 %v2103_v50 }
  0xf1   : > { %920 = vmatprep.subr.bf16.mxu1 %v2107_v52 }
  0xf2   : > { %656 = vmatpush2.bf16.msra.mxu0 %v2069_v43 }
  0xf3   : > { %657 = vmatprep.subr.bf16.mxu0 %v2071_v45 }
  0xf4   : > { %921 = vmatpush2.bf16.msra.mxu1 %v2109_v56 }
  0xf5   : > { %922 = vmatprep.subr.bf16.mxu1 %v2110_v57 }
  0xf6   : > { %658 = vmatpush2.bf16.msra.mxu0 %v2075_v47 }
  0xf7   : > { %659 = vmatprep.subr.bf16.mxu0 %v2077_v49 }
  0xf8   : > { %923 = vmatpush2.bf16.msra.mxu1 %v2112_v58 }
  0xf9   : > { %924 = vmatprep.subr.bf16.mxu1 %v2116_v60 }
  0xfa   : > { %660 = vmatpush2.bf16.msra.mxu0 %v2081_v51 }
  0xfb   : > { %661 = vmatprep.subr.bf16.mxu0 %v2083_v53 }
  0xfc   : > { %925 = vmatpush2.bf16.msra.mxu1 %v2118_v63 }
  0xfd   : > { %926 = vmatprep.subr.bf16.mxu1 %v2119_v1 }
  0xfe   : > { %662 = vmatpush2.bf16.msra.mxu0 %v2087_v54 }
  0xff   : > { %663 = vmatprep.subr.bf16.mxu0 %v2089_v55 }
 0x100   : > { %927 = vmatpush2.bf16.msra.mxu1 %v2121_v4 }
 0x101   : > { %928 = vmatprep.subr.bf16.mxu1 %v2125_v5 }
 0x102   : > { %664 = vmatpush2.bf16.msra.mxu0 %v2093_v59 }
 0x103   : > { %1315 = vmatprep.subr.bf16.mxu0 %v2130_v61 }
 0x104   : > { %929 = vmatpush2.bf16.msra.mxu1 %v2127_v9 }
 0x105   : > { %666 = vmatmul.mubr.bf16.vlgmr.msra.gmra.mxu0 %v2095_v62  ;;  %1855 = vmatprep.subr.bf16.mxu1 %v2130_v61 }
 0x106   : > { %675 = vmatprep.mubr.bf16.mxu0 %v2104_v0  ;;  %1316 = vmatpush1.bf16.msra.mxu0 %v2128_v2 }
 0x107   : > { %1317 = vmatprep.subr.bf16.mxu0 %v2133_v3  ;;  %931 = vmatmul.mubr.bf16.vlgmr.msra.gmra.mxu1 %v2095_v62 }
 0x108   : > { %940 = vmatprep.mubr.bf16.mxu1 %v2104_v0  ;;  %1871 = vmatpush1.bf16.msra.mxu1 %v2128_v2 }
 0x109   : > { %1856 = vmatprep.subr.bf16.mxu1 %v2133_v3 }
 0x10a   : > { %1318 = vmatpush1.bf16.msra.mxu0 %v2131_v6 }
 0x10b   : > { %1319 = vmatprep.subr.bf16.mxu0 %v2136_v7 }
 0x10c   : > { %1872 = vmatpush1.bf16.msra.mxu1 %v2131_v6 }
 0x10d   : > { %676 = vmatmul.mubr.bf16.gmra.mxu0 %v2106_v8  ;;  %1857 = vmatprep.subr.bf16.mxu1 %v2136_v7 }
 0x10e   : > { %685 = vmatprep.mubr.bf16.mxu0 %v2113_v10  ;;  %1320 = vmatpush1.bf16.msra.mxu0 %v2134_v11 }
 0x10f   : > { %1321 = vmatprep.subr.bf16.mxu0 %v2139_v12  ;;  %941 = vmatmul.mubr.bf16.gmra.mxu1 %v2106_v8 }
 0x110   : > { %950 = vmatprep.mubr.bf16.mxu1 %v2113_v10  ;;  %1873 = vmatpush1.bf16.msra.mxu1 %v2134_v11 }
 0x111   : > { %1858 = vmatprep.subr.bf16.mxu1 %v2139_v12 }
 0x112   : > { %1322 = vmatpush1.bf16.msra.mxu0 %v2137_v13 }
 0x113   : > { %1323 = vmatprep.subr.bf16.mxu0 %v2142_v14 }
 0x114   : > { %1874 = vmatpush1.bf16.msra.mxu1 %v2137_v13 }
 0x115   : > { %686 = vmatmul.mubr.bf16.gmra.mxu0 %v2115_v15  ;;  %1859 = vmatprep.subr.bf16.mxu1 %v2142_v14 }
 0x116   : > { %695 = vmatprep.mubr.bf16.mxu0 %v2122_v16  ;;  %1324 = vmatpush1.bf16.msra.mxu0 %v2140_v17 }
 0x117   : > { %951 = vmatmul.mubr.bf16.gmra.mxu1 %v2115_v15  ;;  %1325 = vmatprep.subr.bf16.mxu0 %v2145_v19 }
 0x118   : > { %960 = vmatprep.mubr.bf16.mxu1 %v2122_v16  ;;  %1875 = vmatpush1.bf16.msra.mxu1 %v2140_v17 }
 0x119   : > { %1860 = vmatprep.subr.bf16.mxu1 %v2145_v19 }
 0x11a   : > { %1326 = vmatpush1.bf16.msra.mxu0 %v2143_v20 }
 0x11b   : > { %1327 = vmatprep.subr.bf16.mxu0 %v2148_v21 }
 0x11c   : > { %1876 = vmatpush1.bf16.msra.mxu1 %v2143_v20 }
 0x11d   : > { %696 = vmatmul.mubr.bf16.gmra.mxu0 %v2124_v18  ;;  %1861 = vmatprep.subr.bf16.mxu1 %v2148_v21 }
 0x11e   : > { %1328 = vmatpush1.bf16.msra.mxu0 %v2146_v22 }
 0x11f   : > { %961 = vmatmul.mubr.bf16.gmra.mxu1 %v2124_v18  ;;  %1329 = vmatprep.subr.bf16.mxu0 %v2151_v23 }
 0x120   : > { %1877 = vmatpush1.bf16.msra.mxu1 %v2146_v22 }
 0x121   : > { %1862 = vmatprep.subr.bf16.mxu1 %v2151_v23 }
 0x122   : > { %1330 = vmatpush1.bf16.msra.mxu0 %v2149_v24 }
 0x123   : > { %1331 = vmatprep.subr.bf16.mxu0 %v2154_v25 }
 0x124   : > { %1878 = vmatpush1.bf16.msra.mxu1 %v2149_v24 }
 0x125   : > { %1863 = vmatprep.subr.bf16.mxu1 %v2154_v25 }
 0x126   : > { %1332 = vmatpush2.bf16.msra.mxu0 %v2152_v26 }
 0x127   : > { %1333 = vmatprep.subr.bf16.mxu0 %v2157_v27 }
 0x128   : > { %1879 = vmatpush2.bf16.msra.mxu1 %v2152_v26 }
 0x129   : > { %1864 = vmatprep.subr.bf16.mxu1 %v2157_v27 }
 0x12a   : > { %1334 = vmatpush2.bf16.msra.mxu0 %v2155_v28 }
 0x12b   : > { %1335 = vmatprep.subr.bf16.mxu0 %v2160_v29 }
 0x12c   : > { %1880 = vmatpush2.bf16.msra.mxu1 %v2155_v28 }
 0x12d   : > { %1865 = vmatprep.subr.bf16.mxu1 %v2160_v29 }
 0x12e   : > { %1336 = vmatpush2.bf16.msra.mxu0 %v2158_v30 }
 0x12f   : > { %1337 = vmatprep.subr.bf16.mxu0 %v2163_v31 }
 0x130   : > { %1881 = vmatpush2.bf16.msra.mxu1 %v2158_v30 }
 0x131   : > { %1866 = vmatprep.subr.bf16.mxu1 %v2163_v31 }
 0x132   : > { %1338 = vmatpush2.bf16.msra.mxu0 %v2161_v32 }
 0x133   : > { %1339 = vmatprep.subr.bf16.mxu0 %v2166_v33 }
 0x134   : > { %1882 = vmatpush2.bf16.msra.mxu1 %v2161_v32 }
 0x135   : > { %1867 = vmatprep.subr.bf16.mxu1 %v2166_v33 }
 0x136   : > { %1340 = vmatpush2.bf16.msra.mxu0 %v2164_v34 }
 0x137   : > { %1341 = vmatprep.subr.bf16.mxu0 %v2169_v35 }
 0x138   : > { %1883 = vmatpush2.bf16.msra.mxu1 %v2164_v34 }
 0x139   : > { %1868 = vmatprep.subr.bf16.mxu1 %v2169_v35 }
 0x13a   : > { %1342 = vmatpush2.bf16.msra.mxu0 %v2167_v36 }
 0x13b   : > { %1343 = vmatprep.subr.bf16.mxu0 %v2172_v37 }
 0x13c   : > { %1884 = vmatpush2.bf16.msra.mxu1 %v2167_v36 }
 0x13d   : > { %1869 = vmatprep.subr.bf16.mxu1 %v2172_v37 }
 0x13e   : > { %1344 = vmatpush2.bf16.msra.mxu0 %v2170_v38 }
 0x13f   : > { %1345 = vmatprep.subr.bf16.mxu0 %v2175_v39 }
 0x140   : > { %1885 = vmatpush2.bf16.msra.mxu1 %v2170_v38 }
 0x141   : > { %1870 = vmatprep.subr.bf16.mxu1 %v2175_v39 }
 0x142   : > { %1346 = vmatpush2.bf16.msra.mxu0 %v2173_v40 }
 0x144   : > { %1886 = vmatpush2.bf16.msra.mxu1 %v2173_v40 }
 0x1c5   : > { %v2941_v41 = vpop.f32.mrf.mxu0 }
 0x1c6   : > { %v1770_v42 = vmul.f32 -1.442695, %v2941_v41 }
 0x1c7   : > { %v2944_v43 = vpop.f32.mrf.mxu0  ;;  %v2959_v53 = vpop.f32.mrf.mxu1 }
 0x1c8   : > { %2176 = vpow2.f32 %v1770_v42  ;;  %v1771_v44 = vmul.f32 -1.442695, %v2944_v43 }
 0x1c9   : > { %v2947_v45 = vpop.f32.mrf.mxu0  ;;  %v2964_v56 = vpop.f32.mrf.mxu1 }
 0x1ca   : > { %2178 = vpow2.f32 %v1771_v44  ;;  %v1772_v46 = vmul.f32 -1.442695, %v2947_v45 }
 0x1cb   : > { %v2950_v47 = vpop.f32.mrf.mxu0  ;;  %v2969_v59 = vpop.f32.mrf.mxu1 }
 0x1cc   : > { %2180 = vpow2.f32 %v1772_v46  ;;  %v1773_v48 = vmul.f32 -1.442695, %v2950_v47 }
 0x1cd   : > { %v2953_v49 = vpop.f32.mrf.mxu0  ;;  %v2974_v0 = vpop.f32.mrf.mxu1 }
 0x1ce   : > { %2182 = vpow2.f32 %v1773_v48  ;;  %v1774_v50 = vmul.f32 -1.442695, %v2953_v49 }
 0x1cf   : > { %v2956_v51 = vpop.f32.mrf.mxu0  ;;  %v2982_v9 = vpop.f32.mrf.mxu1 }
 0x1d0   : > { %2184 = vpow2.f32 %v1774_v50  ;;  %v1775_v52 = vmul.f32 -1.442695, %v2956_v51 }
 0x1d1   : > { %v2961_v54 = vpop.f32.mrf.mxu0  ;;  %v2990_v18 = vpop.f32.mrf.mxu1 }
 0x1d2   : > { %2186 = vpow2.f32 %v1775_v52  ;;  %v1776_v55 = vmul.f32 -1.442695, %v2961_v54 }
 0x1d3   : > { %v2966_v57 = vpop.f32.mrf.mxu0  ;;  %v946_v27 = vpop.f32.mrf.mxu1 }
 0x1d4   : > { %2188 = vpow2.f32 %v1776_v55  ;;  %v1777_v58 = vmul.f32 -1.442695, %v2966_v57 }
 0x1d5   : > { %v2177_v60 = vpop.eup %2176  ;;  %v2971_v61 = vpop.f32.mrf.mxu0 }
 0x1d6   : > { %v1019_v62 = vadd.f32 1.0, %v2177_v60  ;;  %2190 = vpow2.f32 %v1777_v58  ;;  %v1778_v63 = vmul.f32 -1.442695, %v2971_v61  ;;  %v948_v34 = vpop.f32.mrf.mxu1 }
 0x1d7   : > { %v2179_v1 = vpop.eup %2178  ;;  %v2976_v2 = vpop.f32.mrf.mxu0 }
 0x1d8   : > { %2192 = vrcp.f32 %v1019_v62  ;;  %v1020_v3 = vadd.f32 1.0, %v2179_v1  ;;  %v1779_v4 = vmul.f32 -1.442695, %v2976_v2  ;;  %v3003_v46 = vpop.f32.mrf.mxu1 }
 0x1d9   : > { %v2181_v5 = vpop.eup %2180  ;;  %2194 = vpow2.f32 %v1778_v63  ;;  %v2979_v6 = vpop.f32.mrf.mxu0 }
 0x1da   : > { %2196 = vrcp.f32 %v1020_v3  ;;  %v1021_v7 = vadd.f32 1.0, %v2181_v5  ;;  %v1780_v8 = vmul.f32 -1.442695, %v2979_v6  ;;  %v954_v3 = vpop.f32.mrf.mxu1 }
 0x1db   : > { %v2183_v10 = vpop.eup %2182  ;;  %2198 = vpow2.f32 %v1779_v4  ;;  %v2984_v11 = vpop.f32.mrf.mxu0 }
 0x1dc   : > { %2200 = vrcp.f32 %v1021_v7  ;;  %v1022_v12 = vadd.f32 1.0, %v2183_v10  ;;  %v1781_v13 = vmul.f32 -1.442695, %v2984_v11 }
 0x1dd   : > { %v2185_v14 = vpop.eup %2184  ;;  %2202 = vpow2.f32 %v1780_v8  ;;  %v2987_v15 = vpop.f32.mrf.mxu0 }
 0x1de   : > { %2204 = vrcp.f32 %v1022_v12  ;;  %v1023_v16 = vadd.f32 1.0, %v2185_v14  ;;  %v1782_v17 = vmul.f32 -1.442695, %v2987_v15 }
 0x1df   : > { %v2187_v19 = vpop.eup %2186  ;;  %2206 = vpow2.f32 %v1781_v13  ;;  %v2992_v20 = vpop.f32.mrf.mxu0 }
 0x1e0   : > { %2208 = vrcp.f32 %v1023_v16  ;;  %v1024_v21 = vadd.f32 1.0, %v2187_v19  ;;  %v1783_v22 = vmul.f32 -1.442695, %v2992_v20 }
 0x1e1   : > { %v2189_v23 = vpop.eup %2188  ;;  %2210 = vpow2.f32 %v1782_v17  ;;  %v2995_v24 = vpop.f32.mrf.mxu0 }
 0x1e2   : > { %2212 = vrcp.f32 %v1024_v21  ;;  %v1025_v25 = vadd.f32 1.0, %v2189_v23  ;;  %v1784_v26 = vmul.f32 -1.442695, %v2995_v24 }
 0x1e3   : > { %v2191_v28 = vpop.eup %2190  ;;  %2214 = vpow2.f32 %v1783_v22  ;;  %v2998_v29 = vpop.f32.mrf.mxu0 }
 0x1e4   : > { %2216 = vrcp.f32 %v1025_v25  ;;  %v1026_v30 = vadd.f32 1.0, %v2191_v28  ;;  %v1785_v31 = vmul.f32 -1.442695, %v2998_v29 }
 0x1e5   : > { %v2193_v32 = vpop.eup %2192  ;;  %2218 = vpow2.f32 %v1784_v26 }
 0x1e6   : > { %v2195_v33 = vpop.eup %2194  ;;  %2220 = vrcp.f32 %v1026_v30  ;;  %v1067_v50 = vmul.f32 %v2193_v32, %v2941_v41 }
 0x1e7   : > { %v2197_v35 = vpop.eup %2196  ;;  %2222 = vpow2.f32 %v1785_v31  ;;  %v1027_v37 = vadd.f32 1.0, %v2195_v33 }
 0x1e8   : > { %v2199_v36 = vpop.eup %2198  ;;  %v1068_v42 = vmul.f32 %v2197_v35, %v2944_v43  ;;  %v1083_v41 = vmul.f32 %v1067_v50, %v2959_v53 }
 0x1e9   : > { %v2201_v38 = vpop.eup %2200  ;;  %v1028_v39 = vadd.f32 1.0, %v2199_v36 }
 0x1ea   : > { %v2203_v40 = vpop.eup %2202  ;;  %v1069_v44 = vmul.f32 %v2201_v38, %v2947_v45  ;;  %v1084_v43 = vmul.f32 %v1068_v42, %v2964_v56  ;;  %v956_v56 = vpop.f32.mrf.mxu1 }
 0x1eb   : > { %v2205_v48 = vpop.eup %2204  ;;  %2224 = vrcp.f32 %v1028_v39  ;;  %v1029_v52 = vadd.f32 1.0, %v2203_v40 }
 0x1ec   : > { %v2207_v55 = vpop.eup %2206  ;;  %v1070_v58 = vmul.f32 %v2205_v48, %v2950_v47  ;;  %2226 = vrcp.f32 %v1027_v37  ;;  %v1085_v63 = vmul.f32 %v1069_v44, %v2969_v59  ;;  %v958_v25 = vpop.f32.mrf.mxu1 }
 0x1ed   : > { %v2209_v60 = vpop.eup %2208  ;;  %2228 = vrcp.f32 %v1029_v52  ;;  %v1030_v62 = vadd.f32 1.0, %v2207_v55 }
 0x1ee   : > { %v2211_v1 = vpop.eup %2210  ;;  %v1086_v45 = vmul.f32 %v1070_v58, %v2974_v0  ;;  %v1115_v12 = vpack.c.bf16 %v1085_v63, %v1083_v41  ;;  %v1071_v0 = vmul.f32 %v2209_v60, %v2953_v49  ;;  %v962_v32 = vpop.f32.mrf.mxu1 }
 0x1ef   : > { %v2213_v4 = vpop.eup %2212  ;;  %2230 = vrcp.f32 %v1030_v62  ;;  %v1031_v7 = vadd.f32 1.0, %v2211_v1 }
 0x1f0   : > { %v2215_v5 = vpop.eup %2214  ;;  %v1116_v8 = vpack.c.bf16 %v1086_v45, %v1084_v43  ;;  %v1072_v14 = vmul.f32 %v2213_v4, %v2956_v51  ;;  %v964_v36 = vpop.f32.mrf.mxu1  ;;  %v1099_v43 = vld [vmem:[#allocation2 + $0x30] sm:$0xff]  ;;  %v1100_v45 = vld [vmem:[#allocation2] sm:$0xff]  ;;  %v1101_v4 = vld [vmem:[#allocation2 + $0x58] sm:$0xff] }
 0x1f1   : > { %v2217_v47 = vpop.eup %2216  ;;  %v1032_v10 = vadd.f32 1.0, %v2215_v5  ;;  %v1102_v5 = vld [vmem:[#allocation2 + $0x18] sm:$0xff] }
 0x1f2   : > { %v2219_v13 = vpop.eup %2218  ;;  %v1073_v59 = vmul.f32 %v2217_v47, %v2961_v54  ;;  %1347 = vmatprep.mubr.bf16.mxu0 %v1116_v8  ;;  %v1088_v23 = vmul.f32 %v1072_v14, %v2990_v18  ;;  %v1087_v54 = vmul.f32 %v1071_v0, %v2982_v9  ;;  %v1103_v8 = vld [vmem:[#allocation2 + $0x50] sm:$0xff]  ;;  %v1106_v0 = vld [vmem:[#allocation2 + $0x48] sm:$0xff] }
 0x1f3   : > { %v2221_v16 = vpop.eup %2220  ;;  %2232 = vrcp.f32 %v1032_v10  ;;  %v1033_v17 = vadd.f32 1.0, %v2219_v13  ;;  %1348 = vmatmul.mubr.bf16.vlgmr.msra.gmra.mxu0 %v1115_v12  ;;  %v1104_v12 = vld [vmem:[#allocation2 + $0x68] sm:$0xff] }
 0x1f4   : > { %v2223_v53 = vpop.eup %2222  ;;  %v1074_v19 = vmul.f32 %v2221_v16, %v2966_v57  ;;  %2234 = vrcp.f32 %v1031_v7  ;;  %v1089_v22 = vmul.f32 %v1073_v59, %v946_v27  ;;  %v1105_v59 = vld [vmem:[#allocation2 + $0x8] sm:$0xff] }
 0x1f5   : > { %2236 = vrcp.f32 %v1033_v17  ;;  %v1034_v21 = vadd.f32 1.0, %v2223_v53 }
 0x1f6   : > { %v1090_v51 = vmul.f32 %v1074_v19, %v948_v34  ;;  %v1117_v30 = vpack.c.bf16 %v1089_v22, %v1087_v54  ;;  %v1109_v54 = vld [vmem:[#allocation2 + $0x10] sm:$0xff] }
 0x1f7   : > { %2238 = vrcp.f32 %v1034_v21  ;;  %v1107_v21 = vld [vmem:[#allocation2 + $0x40] sm:$0xff] }
 0x1f8   : > { %v2225_v26 = vpop.eup %2224  ;;  %v1118_v28 = vpack.c.bf16 %v1090_v51, %v1088_v23  ;;  %v1108_v23 = vld [vmem:[#allocation2 + $0x20] sm:$0xff] }
 0x1f9   : > { %v2227_v49 = vpop.eup %2226  ;;  %v1076_v57 = vmul.f32 %v2225_v26, %v2976_v2  ;;  %v966_v2 = vpop.f32.mrf.mxu1 }
 0x1fa   : > { %v2229_v31 = vpop.eup %2228  ;;  %1357 = vmatprep.mubr.bf16.mxu0 %v1118_v28  ;;  %v1075_v18 = vmul.f32 %v2227_v49, %v2971_v61  ;;  %v1110_v49 = vld [vmem:[#allocation2 + $0x38] sm:$0xff] }
 0x1fb   : > { %v1077_v33 = vmul.f32 %v2229_v31, %v2979_v6  ;;  %1358 = vmatmul.mubr.bf16.gmra.mxu0 %v1117_v30  ;;  %v1092_v9 = vmul.f32 %v1076_v57, %v954_v3  ;;  %v968_v58 = vpop.f32.mrf.mxu1 }
 0x1fc   : > { %v2231_v27 = vpop.eup %2230  ;;  %v1091_v39 = vmul.f32 %v1075_v18, %v3003_v46 }
 0x1fd   : > { %v1078_v34 = vmul.f32 %v2231_v27, %v2984_v11  ;;  %v1093_v35 = vmul.f32 %v1077_v33, %v956_v56  ;;  %v1112_v27 = vld [vmem:[#allocation2 + $0x70] sm:$0xff] }
 0x1ff   : > { %v1094_v37 = vmul.f32 %v1078_v34, %v958_v25  ;;  %v1119_v48 = vpack.c.bf16 %v1093_v35, %v1091_v39  ;;  %v1113_v35 = vld [vmem:[#allocation2 + $0x78] sm:$0xff] }
 0x200   : > { %v2233_v38 = vpop.eup %2232 }
 0x201   : > { %v2235_v40 = vpop.eup %2234  ;;  %v1120_v42 = vpack.c.bf16 %v1094_v37, %v1092_v9  ;;  %v1080_v6 = vmul.f32 %v2233_v38, %v2992_v20  ;;  %v1114_v37 = vld [vmem:[#allocation2 + $0x28] sm:$0xff] }
 0x202   : > { %v2237_v44 = vpop.eup %2236  ;;  %v1079_v11 = vmul.f32 %v2235_v40, %v2987_v15 }
 0x203   : > { %v1081_v50 = vmul.f32 %v2237_v44, %v2995_v24  ;;  %1367 = vmatprep.mubr.bf16.mxu1 %v1120_v42  ;;  %v1096_v60 = vmul.f32 %v1080_v6, %v964_v36 }
 0x204   : > { %v2239_v61 = vpop.eup %2238  ;;  %1368 = vmatmul.mubr.bf16.vlgmr.msra.gmra.mxu1 %v1119_v48  ;;  %v1095_v62 = vmul.f32 %v1079_v11, %v962_v32  ;;  %v1111_v32 = vld [vmem:[#allocation2 + $0x60] sm:$0xff] }
 0x205   : > { %v1082_v52 = vmul.f32 %v2239_v61, %v2998_v29  ;;  %v1097_v55 = vmul.f32 %v1081_v50, %v966_v2 }
 0x207   : > { %v1098_v46 = vmul.f32 %v1082_v52, %v968_v58  ;;  %v1121_v1 = vpack.c.bf16 %v1097_v55, %v1095_v62 }
 0x209   : > { %v1122_v63 = vpack.c.bf16 %v1098_v46, %v1096_v60 }
 0x20b   : > { %1377 = vmatprep.mubr.bf16.mxu1 %v1122_v63 }
 0x20c   : > { %1378 = vmatmul.mubr.bf16.gmra.mxu1 %v1121_v1 }
 0x2b3   : > { %v1349_v20 = vpop.f32.mrf.mxu0 }
 0x2b4   : > { %v1388_v24 = vadd.f32 %v1349_v20, %v1099_v43 }
 0x2b5   : > { %v1351_v3 = vpop.f32.mrf.mxu0 }
 0x2b6   : > { %1404 = vst [vmem:[#allocation2 + $0x30] sm:$0xff] %v1388_v24  ;;  %v1389_v15 = vadd.f32 %v1351_v3, %v1100_v45 }
 0x2b7   : > { %v1353_v41 = vpop.f32.mrf.mxu0 }
 0x2b8   : > { %1405 = vst [vmem:[#allocation2] sm:$0xff] %v1389_v15  ;;  %v1390_v29 = vadd.f32 %v1353_v41, %v1101_v4 }
 0x2b9   : > { %v1355_v7 = vpop.f32.mrf.mxu0 }
 0x2ba   : > { %1406 = vst [vmem:[#allocation2 + $0x58] sm:$0xff] %v1390_v29  ;;  %v1391_v47 = vadd.f32 %v1355_v7, %v1102_v5 }
 0x2bb   : > { %v1359_v10 = vpop.f32.mrf.mxu0 }
 0x2bc   : > { %1407 = vst [vmem:[#allocation2 + $0x18] sm:$0xff] %v1391_v47  ;;  %v1392_v13 = vadd.f32 %v1359_v10, %v1103_v8 }
 0x2bd   : > { %v1361_v14 = vpop.f32.mrf.mxu0 }
 0x2be   : > { %1408 = vst [vmem:[#allocation2 + $0x50] sm:$0xff] %v1392_v13  ;;  %v1393_v56 = vadd.f32 %v1361_v14, %v1104_v12 }
 0x2bf   : > { %v1363_v16 = vpop.f32.mrf.mxu0 }
 0x2c0   : > { %1409 = vst [vmem:[#allocation2 + $0x68] sm:$0xff] %v1393_v56  ;;  %v1394_v17 = vadd.f32 %v1363_v16, %v1105_v59 }
 0x2c1   : > { %v1365_v53 = vpop.f32.mrf.mxu0 }
 0x2c2   : > { %1410 = vst [vmem:[#allocation2 + $0x8] sm:$0xff] %v1394_v17  ;;  %v1395_v19 = vadd.f32 %v1365_v53, %v1106_v0 }
 0x2c4   : > { %1411 = vst [vmem:[#allocation2 + $0x48] sm:$0xff] %v1395_v19  ;;  %v1369_v22 = vpop.f32.mrf.mxu1 }
 0x2c5   : > { %v1396_v51 = vadd.f32 %v1369_v22, %v1107_v21 }
 0x2c6   : > { %v1371_v25 = vpop.f32.mrf.mxu1 }
 0x2c7   : > { %1412 = vst [vmem:[#allocation2 + $0x40] sm:$0xff] %v1396_v51  ;;  %v1397_v26 = vadd.f32 %v1371_v25, %v1108_v23 }
 0x2c8   : > { %v1373_v28 = vpop.f32.mrf.mxu1 }
 0x2c9   : > { %1413 = vst [vmem:[#allocation2 + $0x20] sm:$0xff] %v1397_v26  ;;  %v1398_v30 = vadd.f32 %v1373_v28, %v1109_v54 }
 0x2ca   : > { %v1375_v31 = vpop.f32.mrf.mxu1 }
 0x2cb   : > { %1414 = vst [vmem:[#allocation2 + $0x10] sm:$0xff] %v1398_v30  ;;  %v1399_v57 = vadd.f32 %v1375_v31, %v1110_v49 }
 0x2cc   : > { %v1379_v33 = vpop.f32.mrf.mxu1 }
 0x2cd   : > { %1415 = vst [vmem:[#allocation2 + $0x38] sm:$0xff] %v1399_v57  ;;  %v1400_v18 = vadd.f32 %v1379_v33, %v1111_v32 }
 0x2ce   : > { %v1381_v34 = vpop.f32.mrf.mxu1 }
 0x2cf   : > { %1416 = vst [vmem:[#allocation2 + $0x60] sm:$0xff] %v1400_v18  ;;  %v1401_v36 = vadd.f32 %v1381_v34, %v1112_v27 }
 0x2d0   : > { %v1383_v9 = vpop.f32.mrf.mxu1 }
 0x2d1   : > { %1417 = vst [vmem:[#allocation2 + $0x70] sm:$0xff] %v1401_v36  ;;  %v1402_v38 = vadd.f32 %v1383_v9, %v1113_v35  ;;  %1423 = sbr.rel (%p1818_p11) target bundleno = 736 (0x2e0), region = 60 }
 0x2d2   : > { %v1385_v39 = vpop.f32.mrf.mxu1 }
 0x2d3   : > { %1418 = vst [vmem:[#allocation2 + $0x78] sm:$0xff] %v1402_v38  ;;  %v1403_v40 = vadd.f32 %v1385_v39, %v1114_v37 }
 0x2d5   : > { %1419 = vst [vmem:[#allocation2 + $0x28] sm:$0xff] %v1403_v40 }
 0x2d6   : > { %v1424_v42 = vld [vmem:[#allocation2 + $0x30] sm:$0xff]  ;;  %v1425_v44 = vld [vmem:[#allocation2] sm:$0xff]  ;;  %v1426_v48 = vld [vmem:[#allocation2 + $0x58] sm:$0xff] }
 0x2d7   : > { %v1844_v2 = vpack.c.bf16 %v1425_v44, %v1424_v42  ;;  %v1427_v6 = vld [vmem:[#allocation2 + $0x18] sm:$0xff]  ;;  %v1428_v50 = vld [vmem:[#allocation2 + $0x50] sm:$0xff]  ;;  %v1429_v61 = vld [vmem:[#allocation2 + $0x68] sm:$0xff] }
 0x2d8   : > { %v1845_v11 = vpack.c.bf16 %v1427_v6, %v1426_v48  ;;  %v1846_v52 = vpack.c.bf16 %v1429_v61, %v1428_v50  ;;  %v1430_v55 = vld [vmem:[#allocation2 + $0x8] sm:$0xff]  ;;  %v1432_v60 = vld [vmem:[#allocation2 + $0x40] sm:$0xff]  ;;  %v1434_v63 = vld [vmem:[#allocation2 + $0x10] sm:$0xff] }
 0x2d9   : > { %v1431_v58 = vld [vmem:[#allocation2 + $0x48] sm:$0xff]  ;;  %1488 = vst [vmem:[%s2834_s16] sm:$0xff] %v1844_v2  ;;  %v1433_v62 = vld [vmem:[#allocation2 + $0x20] sm:$0xff]  ;;  %v1435_v1 = vld [vmem:[#allocation2 + $0x38] sm:$0xff] }
 0x2da   : > { %v1847_v46 = vpack.c.bf16 %v1431_v58, %v1430_v55  ;;  %1489 = vst [vmem:[%s2834_s16 + $0x8] sm:$0xff] %v1845_v11  ;;  %1490 = vst [vmem:[%s2834_s16 + $0x10] sm:$0xff] %v1846_v52  ;;  %v1848_v43 = vpack.c.bf16 %v1433_v62, %v1432_v60  ;;  %v1849_v20 = vpack.c.bf16 %v1435_v1, %v1434_v63  ;;  %v1436_v45 = vld [vmem:[#allocation2 + $0x60] sm:$0xff]  ;;  %v1437_v24 = vld [vmem:[#allocation2 + $0x70] sm:$0xff] }
 0x2db   : > { %v1438_v3 = vld [vmem:[#allocation2 + $0x78] sm:$0xff]  ;;  %v1850_v4 = vpack.c.bf16 %v1437_v24, %v1436_v45 }
 0x2dc   : > { %1491 = vst [vmem:[%s2834_s16 + $0x18] sm:$0xff] %v1847_v46  ;;  %v1439_v15 = vld [vmem:[#allocation2 + $0x28] sm:$0xff]  ;;  %1492 = vst [vmem:[%s2834_s16 + $0x20] sm:$0xff] %v1848_v43 }
 0x2dd   : > { %1493 = vst [vmem:[%s2834_s16 + $0x28] sm:$0xff] %v1849_v20  ;;  %v1851_v41 = vpack.c.bf16 %v1439_v15, %v1438_v3  ;;  %1494 = vst [vmem:[%s2834_s16 + $0x30] sm:$0xff] %v1850_v4 }
 0x2df   : > { %1495 = vst [vmem:[%s2834_s16 + $0x38] sm:$0xff] %v1851_v41 }
 0x2e0 PF: > { %s1497_s14 = scalar_lea.sflag [#allocation5], %s2803_s1  ;;  %s3195_s6 = sld [smem:[#allocation31_spill]] }
 0x2e6   : > { %p3196_p13 = scmp.ne.s32.totalorder %s3195_s6, 0 }
 0x2e7   : > { %s3197_s10 = sld [smem:[#allocation22_spill]] (%p3196_p13) }
 0x2e8   : > { %1503 = sbr.rel (!%p3196_p13) target bundleno = 781 (0x30d), region = 64 }
 0x2ed   : > { %s1828_s13 = sshll.u32 %s3197_s10, 3 }
 0x2ee   : > { %s1505_s23 = ssub.s32 17, %s1828_s13 }
 0x2ef   : > { %p1506_p5 = scmp.lt.s32.totalorder %s1505_s23, 8 }
 0x2f1   : > { %s3231_s23 = smov (!%p1506_p5, %s1505_s23), 8 }
 0x2f2   : > { %s3039_s9 = sshll.u32 %s3231_s23, 7 }
 0x2f3   : > { %s1511_s4 = ssub.s32 1024, %s3039_s9 }
 0x2f4   : > { %1512 = vsyncadd %s1497_s14, %s1511_s4  ;;  %p1831_p8 = scmp.ne.s32.totalorder %s3039_s9, 0  ;;  %s1854_s12 = sshll.u32 %s3197_s10, 10 }
 0x2f5   : > { %s3198_s7 = sld [smem:[#allocation35_spill]]  ;;  %s1518_s0 = sshll.u32 %s2834_s16, 4  ;;  %s3052_s0 = int_to_ptr.vmem [resolvable:$true] %s1518_s0 }
 0x2f6   : > { %s2345_s24 = scalar_lea.vmem %s3052_s0, %s3039_s9  ;;  %s2513_s5 = smov [#allocation11]  }
 0x2f7   : > { %p2346_p10 = scmp.ne.s32.totalorder %s3052_s0, %s2345_s24  ;;  %s2349_s30 = sshll.u32 %s2513_s5, 4  ;;  %s2350_s30 = int_to_ptr.vmem [resolvable:$false] %s2349_s30 }
 0x2f8   : > { %s2351_s25 = scalar_lea.vmem %s2350_s30, 2048  ;;  %p2352_p1 = scmp.lt.s32.totalorder %s3052_s0, %s2350_s30 }
 0x2f9   : > { %p2347_p9 = pnand %p2346_p10, %p1831_p8  ;;  %p2353_p6 = scmp.lt.s32.totalorder %s2351_s25, %s2345_s24 }
 0x2fb   : > { %s3049_s18 = scalar_lea.hbm %s3198_s7, %s1854_s12  ;;  %p2348_p2 = pneg %p2347_p9 }
 0x2fc   : > { %p2354_p7 = por %p2353_p6, %p2352_p1 }
 0x2fe   : > { %p2355_p4 = pnand %p2354_p7, %p2348_p2 }
 0x300   : > { %2358 = shalt.err (!%p2355_p4)
}
 0x301   : > { %s2359_s11 = scalar_lea.hbm %s3049_s18, %s3039_s9  ;;  %s2363_s16 = scalar_lea.hbm %s3198_s7, 2176 }
 0x302   : > { %p2360_p0 = scmp.ne.s32.totalorder %s3049_s18, %s2359_s11  ;;  %p2364_p11 = scmp.lt.s32.totalorder %s3049_s18, %s3198_s7 }
 0x303   : > { %p2365_p13 = scmp.lt.s32.totalorder %s2363_s16, %s2359_s11 }
 0x304   : > { %p2361_p12 = pnand %p2360_p0, %p1831_p8 }
 0x305   : > { %p2366_p5 = por %p2365_p13, %p2364_p11 }
 0x306   : > { %p2362_p3 = pneg %p2361_p12 }
 0x308   : > { %p2367_p10 = pnand %p2366_p5, %p2362_p3 }
 0x30a   : > { %2370 = shalt.err (!%p2367_p10)
}
 0x30b   : > { %s2514_s6 = smov 128   ;;  %s2515_s10 = smov 8  }
 0x30c   : > { %1524 = dma.vmem_to_hbm [thread:$0]  (%p1831_p8), %s3052_s0, %s3039_s9, %s3049_s18, %s1497_s14, %s2514_s6, %s2514_s6, %s2515_s10  }
 0x30d PF: > { %s3199_s13 = sld [smem:[#allocation19_spill]]  ;;  %p1899_p9 = scmp.ge.s32.totalorder %s2501_s28, 2 }
 0x30e   : > { %s3200_s23 = sld [smem:[#allocation32_spill]] }
 0x313   : > { %s1533_s4 = sand.u32 1, %s3199_s13  }
 0x314   : > { %p3201_p2 = scmp.ne.s32.totalorder %s3200_s23, 0  ;;  %s1534_s12 = scalar_lea.sflag [#allocation5], %s1533_s4 }
 0x316   : > { %p1896_p1 = pnand %p1899_p9, %p3201_p2 }
 0x318   : > { %p1897_p6 = pneg %p1896_p1 }
 0x31a   : > { %2444 = dma.done.wait (%p1897_p6), %s1534_s12, 1024  }
 0x31b   : > { %2446 = vsyncadd (%p1897_p6), %s1534_s12, 4294966272  ;;  %s26_s28 = sadd.s32 1, %s2501_s28   ;;  %s3203_s15 = sld [smem:[#allocation17_spill]] }
 0x31c   : > { %p3084_p7 = scmp.ge.s32.totalorder %s26_s28, 8   ;;  %s3204_s1 = sld [smem:[#allocation29_spill]] }
 0x31d   : > { %s3205_s18 = sld [smem:[#allocation18_spill]]  ;;  %s3213_s16 = smov %s2457_s17 }
 0x31e   : > { %s3206_s14 = sld [smem:[#allocation26_spill]]  ;;  %s3215_s19 = smov %s2469_s20 }
 0x31f   : > { %s3207_s9 = sld [smem:[#allocation20_spill]]  ;;  %s3217_s21 = smov %s2477_s22 }
 0x320   : > { %s3208_s23 = sld [smem:[#allocation27_spill]]  ;;  %s3219_s24 = smov %s2493_s26 }
 0x321   : > { %s3209_s25 = sld [smem:[#allocation23_spill]] }
 0x322   : > { %s3210_s0 = sld [smem:[#allocation24_spill]]  ;;  %s3214_s17 = smov %s3204_s1 }
 0x323   : > { %s3211_s5 = sld [smem:[#allocation25_spill]] }
 0x324   : > { %s3216_s20 = smov %s3206_s14 }
 0x325   : > { %s3218_s22 = smov %s3207_s9  ;;  %25 = sbr.rel (!%p3084_p7) target bundleno = 18 (0x12), region = 126 }
 0x328   : > { %s3220_s26 = smov %s3210_s0 }
 0x329   : > { %s3221_s27 = smov %s3211_s5 }
 0x32a   :  { %1539 = vsyncpa [#allocation4], 1 }
 0x32b   :  { %1541 = vsyncpa [#allocation4 + $0x1], 1 }
 0x32c   :  { %1542 = vsyncpa [#allocation7], 1 }
 0x32d   :  { %1544 = vsyncpa [#allocation7 + $0x1], 1 }
 0x32e   :  { %1545 = vsyncpa [#allocation10], 1 }
 0x32f   :  { %1547 = vsyncpa [#allocation10 + $0x1], 1 }
 0x330   :  { %1548 = vsyncpa [#allocation5], 1 }
 0x331   :  { %1550 = vsyncpa [#allocation5 + $0x1], 1 }

</bundles_post_ra>
